<compile_context>
chip_gen: v7x
topology: tpu7x:2x2x1
jax: 0.10.0
libtpu: 0.0.40
codegen_flags: <defaults>
</compile_context>

<pallas_src>
import functools

import jax
import jax.numpy as jnp
from jax.experimental import pallas as pl
from jax.experimental.pallas import tpu as pltpu

_LANE = 128
_SUBLANE = 8


def _round_up(v, m):
    return ((v + m - 1) // m) * m


def _cdiv(a, b):
    return -(-a // b)


def _mlp_mse_kernel(y_ref, x_ref,
                    w1_ref, b1_ref,
                    w2_ref, b2_ref,
                    w3_ref, b3_ref,
                    s_ref, o_ref):
    """Packed-timestep MLP + per-timestep MSE (all lane-dense, no transposes).

    y:  [row_tile, P*in_f]   P consecutive timesteps packed along lanes
    x:  [row_tile, P*x_dim]
    wK: block-diagonal kron(I_P, W_K^T) replicas (natural orientation)
    s:  [P*x_dim, P] segmented-mean matrix (includes the 1/x_dim factor)
    o:  [row_tile, P] -> reshapes back to per-timestep MSE [T] in the wrapper
    """
    h1 = jnp.tanh(jnp.dot(y_ref[...], w1_ref[...],
                          preferred_element_type=jnp.float32) + b1_ref[...])
    h2 = jnp.tanh(jnp.dot(h1, w2_ref[...],
                          preferred_element_type=jnp.float32) + b2_ref[...])
    xhat = jnp.dot(h2, w3_ref[...],
                   preferred_element_type=jnp.float32) + b3_ref[...]
    diff = xhat - x_ref[...]
    # Segmented mean over each timestep's x_dim lanes via one more MXU op.
    o_ref[...] = jnp.dot(diff * diff, s_ref[...],
                         preferred_element_type=jnp.float32)


@functools.partial(jax.jit, static_argnames=("t_tile",))
def fully_connected_mse_forward(y, x, params, *, t_tile=8192):
    """Pallas-backed forward pass.

    y: [T, 2*num_freqs] f32, x: [T, x_dim] f32.
    params: w1 (n, 2F), w2 (32, n), w3 (x_dim, 32) in PyTorch (out, in) layout;
            b1 (n,), b2 (32,), b3 (x_dim,).
    returns: [T] f32 per-timestep MSE.
    """
    T, in_f = y.shape
    x_dim = x.shape[1]
    w1 = params["w1"].astype(jnp.float32)
    w2 = params["w2"].astype(jnp.float32)
    w3 = params["w3"].astype(jnp.float32)
    b1 = params["b1"].reshape(-1).astype(jnp.float32)
    b2 = params["b2"].reshape(-1).astype(jnp.float32)
    b3 = params["b3"].reshape(-1).astype(jnp.float32)
    n = w1.shape[0]
    n2 = w2.shape[0]

    # P timesteps packed per lane row (P=16 when 2*num_freqs=8 -> exactly 128 lanes).
    P = max(1, _LANE // in_f)
    quant = _SUBLANE * P              # timestep granularity (128): 8 sublane rows/chunk

    # --- Tiling: big tiles, pad only to `quant`, keep >=2 grid steps for v7x ---
    T_q = _round_up(max(T, 1), quant)
    k = T_q // quant                  # number of quant-sized timestep chunks
    tgt_chunks = max(1, min(t_tile, T_q) // quant)
    min_steps = 2 if k >= 2 else 1    # both v7x TensorCores get work
    steps = max(min_steps, _cdiv(k, tgt_chunks))
    for cand in range(steps, min(k, steps + 4) + 1):   # prefer zero pad waste
        if k % cand == 0:
            steps = cand
            break
    chunks = _cdiv(k, steps)
    t_step = chunks * quant           # timesteps per grid step
    T_pad = t_step * steps            # worst-case pad ~128*steps, not (t_tile-128)
    row_tile = t_step // P
    R_pad = T_pad // P
    grid = (steps,)

    # --- Inputs: pad ragged tail only (no transpose), then a free reshape ---
    yf = y.astype(jnp.float32)
    xf = x.astype(jnp.float32)
    if T_pad != T:
        yf = jnp.pad(yf, ((0, T_pad - T), (0, 0)))
        xf = jnp.pad(xf, ((0, T_pad - T), (0, 0)))
    y_rs = yf.reshape(R_pad, P * in_f)
    x_rs = xf.reshape(R_pad, P * x_dim)

    # --- Block-diagonal weights (built once per call; tiny) ---
    eye_p = jnp.eye(P, dtype=jnp.float32)
    w1bd = jnp.kron(eye_p, w1.T)                     # [P*in_f, P*n]
    w2bd = jnp.kron(eye_p, w2.T)                     # [P*n,   P*n2]
    w3bd = jnp.kron(eye_p, w3.T)                     # [P*n2,  P*x_dim]
    b1bd = jnp.tile(b1, P)[None, :]                  # [1, P*n]
    b2bd = jnp.tile(b2, P)[None, :]                  # [1, P*n2]
    b3bd = jnp.tile(b3, P)[None, :]                  # [1, P*x_dim]
    s_mat = jnp.kron(eye_p, jnp.full((x_dim, 1), 1.0 / x_dim, jnp.float32))

    def resident(shape):
        # Full block, same block index every grid step -> stays VMEM-resident.
        return pl.BlockSpec(shape, lambda i: (0, 0))

    out = pl.pallas_call(
        _mlp_mse_kernel,
        out_shape=jax.ShapeDtypeStruct((R_pad, P), jnp.float32),
        grid=grid,
        in_specs=[
            pl.BlockSpec((row_tile, P * in_f), lambda i: (i, 0)),   # y tile
            pl.BlockSpec((row_tile, P * x_dim), lambda i: (i, 0)),  # x tile
            resident((P * in_f, P * n)),     # w1bd
            resident((1, P * n)),            # b1bd
            resident((P * n, P * n2)),       # w2bd
            resident((1, P * n2)),           # b2bd
            resident((P * n2, P * x_dim)),   # w3bd
            resident((1, P * x_dim)),        # b3bd
            resident((P * x_dim, P)),        # segmented-mean matrix
        ],
        out_specs=pl.BlockSpec((row_tile, P), lambda i: (i, 0)),
        compiler_params=pltpu.CompilerParams(
            dimension_semantics=("parallel",)),  # shards T tiles across v7x TCs
    )(y_rs, x_rs, w1bd, b1bd, w2bd, b2bd, w3bd, b3bd, s_mat)

    # Row-major reshape back to [T_pad]; drop the padded tail (garbage MSE of
    # zero-padded timesteps).
    return out.reshape(T_pad)[:T]


def init_params(key, x_dim, num_freqs, n):
    """PyTorch-Linear-style uniform init; weights (out, in), biases (out,)."""
    ks = jax.random.split(key, 6)

    def linear(kw, kb, fan_in, fan_out):
        bound = 1.0 / jnp.sqrt(jnp.float32(fan_in))
        w = jax.random.uniform(kw, (fan_out, fan_in), jnp.float32, -bound, bound)
        b = jax.random.uniform(kb, (fan_out,), jnp.float32, -bound, bound)
        return w, b

    w1, b1 = linear(ks[0], ks[1], 2 * num_freqs, n)
    w2, b2 = linear(ks[2], ks[3], n, 32)
    w3, b3 = linear(ks[4], ks[5], 32, x_dim)
    return {"w1": w1, "b1": b1, "w2": w2, "b2": b2, "w3": w3, "b3": b3}


def reference_forward(y, x, params):
    h1 = jnp.tanh(y @ params["w1"].T + params["b1"])
    h2 = jnp.tanh(h1 @ params["w2"].T + params["b2"])
    xhat = h2 @ params["w3"].T + params["b3"]
    return jnp.mean((xhat - x) ** 2, axis=-1)


if __name__ == "__main__":
    # Small shapes consistent with the module: T=8 snapshots, num_freqs=4
    # (y has 2*4=8 features), hidden n=32, x_dim=16.
    T, num_freqs, n, x_dim = 8, 4, 32, 16

    key = jax.random.PRNGKey(0)
    k_y, k_x, k_p, k_y2, k_x2 = jax.random.split(key, 5)
    y = jax.random.normal(k_y, (T, 2 * num_freqs), jnp.float32)
    x = jax.random.normal(k_x, (T, x_dim), jnp.float32)
    params = init_params(k_p, x_dim, num_freqs, n)

    out = fully_connected_mse_forward(y, x, params)
    out = jax.block_until_ready(out)
    ref = reference_forward(y, x, params)
    assert out.shape == (T,)
    assert jnp.allclose(out, ref, atol=1e-5, rtol=1e-5), (out, ref)

    # Exercise the multi-tile grid path + a ragged (zero-padded, masked-off) tail.
    T2 = 300
    y2 = jax.random.normal(k_y2, (T2, 2 * num_freqs), jnp.float32)
    x2 = jax.random.normal(k_x2, (T2, x_dim), jnp.float32)
    out2 = fully_connected_mse_forward(y2, x2, params, t_tile=256)
    out2 = jax.block_until_ready(out2)
    ref2 = reference_forward(y2, x2, params)
    assert out2.shape == (T2,)
    assert jnp.allclose(out2, ref2, atol=1e-5, rtol=1e-5), (out2, ref2)

    print("KERNEL_OK")
</pallas_src>

<mosaic_0001>
module attributes {stable_mosaic.version = 11 : i64} {
  func.func @_mlp_mse_kernel(%arg0: i32, %arg1: memref<8x128xf32, #tpu.memory_space<vmem>>, %arg2: memref<8x256xf32, #tpu.memory_space<vmem>>, %arg3: memref<128x512xf32, #tpu.memory_space<vmem>>, %arg4: memref<1x512xf32, #tpu.memory_space<vmem>>, %arg5: memref<512x512xf32, #tpu.memory_space<vmem>>, %arg6: memref<1x512xf32, #tpu.memory_space<vmem>>, %arg7: memref<512x256xf32, #tpu.memory_space<vmem>>, %arg8: memref<1x256xf32, #tpu.memory_space<vmem>>, %arg9: memref<256x16xf32, #tpu.memory_space<vmem>>, %arg10: memref<8x16xf32, #tpu.memory_space<vmem>>) attributes {dimension_semantics = [#tpu.dimension_semantics<parallel>], iteration_bounds = array<i64: 1>, scalar_prefetch = 0 : i64, scratch_operands = 0 : i64, tpu.core_type = #tpu.core_type<tc>, window_params = [{transform_indices = @transform_0, window_bounds = array<i64: 8, 128>}, {transform_indices = @transform_1, window_bounds = array<i64: 8, 256>}, {pipeline_mode = #tpu.pipeline_mode<synchronous>, transform_indices = @transform_2, window_bounds = array<i64: 128, 512>}, {pipeline_mode = #tpu.pipeline_mode<synchronous>, transform_indices = @transform_3, window_bounds = array<i64: 1, 512>}, {pipeline_mode = #tpu.pipeline_mode<synchronous>, transform_indices = @transform_4, window_bounds = array<i64: 512, 512>}, {pipeline_mode = #tpu.pipeline_mode<synchronous>, transform_indices = @transform_5, window_bounds = array<i64: 1, 512>}, {pipeline_mode = #tpu.pipeline_mode<synchronous>, transform_indices = @transform_6, window_bounds = array<i64: 512, 256>}, {pipeline_mode = #tpu.pipeline_mode<synchronous>, transform_indices = @transform_7, window_bounds = array<i64: 1, 256>}, {pipeline_mode = #tpu.pipeline_mode<synchronous>, transform_indices = @transform_8, window_bounds = array<i64: 256, 16>}, {transform_indices = @transform_9, window_bounds = array<i64: 8, 16>}]} {
    %c0 = arith.constant 0 : index
    %c0_0 = arith.constant 0 : index
    %0 = vector.load %arg1[%c0, %c0_0] : memref<8x128xf32, #tpu.memory_space<vmem>>, vector<8x128xf32>
    %c0_1 = arith.constant 0 : index
    %c0_2 = arith.constant 0 : index
    %1 = vector.load %arg3[%c0_1, %c0_2] : memref<128x512xf32, #tpu.memory_space<vmem>>, vector<128x512xf32>
    %cst = arith.constant dense<0.000000e+00> : vector<8x512xf32>
    %2 = tpu.matmul %0, %1, %cst {dimension_numbers = #tpu.dot_dimension_numbers<[1], [0], [0], [1], [0, 0, 1, 1], [], []>} : vector<8x128xf32>, vector<128x512xf32>, vector<8x512xf32> -> vector<8x512xf32>
    %c0_3 = arith.constant 0 : index
    %c0_4 = arith.constant 0 : index
    %3 = vector.load %arg4[%c0_3, %c0_4] : memref<1x512xf32, #tpu.memory_space<vmem>>, vector<1x512xf32>
    %4 = vector.broadcast %3 : vector<1x512xf32> to vector<8x512xf32>
    %5 = arith.addf %2, %4 : vector<8x512xf32>
    %6 = math.tanh %5 : vector<8x512xf32>
    %c0_5 = arith.constant 0 : index
    %c0_6 = arith.constant 0 : index
    %7 = vector.load %arg5[%c0_5, %c0_6] : memref<512x512xf32, #tpu.memory_space<vmem>>, vector<512x512xf32>
    %cst_7 = arith.constant dense<0.000000e+00> : vector<8x512xf32>
    %8 = tpu.matmul %6, %7, %cst_7 {dimension_numbers = #tpu.dot_dimension_numbers<[1], [0], [0], [1], [0, 0, 1, 1], [], []>} : vector<8x512xf32>, vector<512x512xf32>, vector<8x512xf32> -> vector<8x512xf32>
    %c0_8 = arith.constant 0 : index
    %c0_9 = arith.constant 0 : index
    %9 = vector.load %arg6[%c0_8, %c0_9] : memref<1x512xf32, #tpu.memory_space<vmem>>, vector<1x512xf32>
    %10 = vector.broadcast %9 : vector<1x512xf32> to vector<8x512xf32>
    %11 = arith.addf %8, %10 : vector<8x512xf32>
    %12 = math.tanh %11 : vector<8x512xf32>
    %c0_10 = arith.constant 0 : index
    %c0_11 = arith.constant 0 : index
    %13 = vector.load %arg7[%c0_10, %c0_11] : memref<512x256xf32, #tpu.memory_space<vmem>>, vector<512x256xf32>
    %cst_12 = arith.constant dense<0.000000e+00> : vector<8x256xf32>
    %14 = tpu.matmul %12, %13, %cst_12 {dimension_numbers = #tpu.dot_dimension_numbers<[1], [0], [0], [1], [0, 0, 1, 1], [], []>} : vector<8x512xf32>, vector<512x256xf32>, vector<8x256xf32> -> vector<8x256xf32>
    %c0_13 = arith.constant 0 : index
    %c0_14 = arith.constant 0 : index
    %15 = vector.load %arg8[%c0_13, %c0_14] : memref<1x256xf32, #tpu.memory_space<vmem>>, vector<1x256xf32>
    %16 = vector.broadcast %15 : vector<1x256xf32> to vector<8x256xf32>
    %17 = arith.addf %14, %16 : vector<8x256xf32>
    %c0_15 = arith.constant 0 : index
    %c0_16 = arith.constant 0 : index
    %18 = vector.load %arg2[%c0_15, %c0_16] : memref<8x256xf32, #tpu.memory_space<vmem>>, vector<8x256xf32>
    %19 = arith.subf %17, %18 : vector<8x256xf32>
    %20 = arith.mulf %19, %19 : vector<8x256xf32>
    %c0_17 = arith.constant 0 : index
    %c0_18 = arith.constant 0 : index
    %21 = vector.load %arg9[%c0_17, %c0_18] : memref<256x16xf32, #tpu.memory_space<vmem>>, vector<256x16xf32>
    %cst_19 = arith.constant dense<0.000000e+00> : vector<8x16xf32>
    %22 = tpu.matmul %20, %21, %cst_19 {dimension_numbers = #tpu.dot_dimension_numbers<[1], [0], [0], [1], [0, 0, 1, 1], [], []>} : vector<8x256xf32>, vector<256x16xf32>, vector<8x16xf32> -> vector<8x16xf32>
    %c0_20 = arith.constant 0 : index
    %c0_21 = arith.constant 0 : index
    %23 = vector.load %arg10[%c0_20, %c0_21] : memref<8x16xf32, #tpu.memory_space<vmem>>, vector<8x16xf32>
    tpu.vector_store %arg10[%c0_20, %c0_21], %22 {strides = array<i32>} : memref<8x16xf32, #tpu.memory_space<vmem>>, vector<8x16xf32>,
    return
  }
  func.func @transform_0(%arg0: i32) -> (i32, i32) {
    %c0_i32 = arith.constant 0 : i32
    %c0_i32_0 = arith.constant 0 : i32
    return %arg0, %c0_i32 : i32, i32
  }
  func.func @transform_1(%arg0: i32) -> (i32, i32) {
    %c0_i32 = arith.constant 0 : i32
    %c0_i32_0 = arith.constant 0 : i32
    return %arg0, %c0_i32 : i32, i32
  }
  func.func @transform_2(%arg0: i32) -> (i32, i32) {
    %c0_i32 = arith.constant 0 : i32
    %c0_i32_0 = arith.constant 0 : i32
    %c0_i32_1 = arith.constant 0 : i32
    return %c0_i32, %c0_i32_0 : i32, i32
  }
  func.func @transform_3(%arg0: i32) -> (i32, i32) {
    %c0_i32 = arith.constant 0 : i32
    %c0_i32_0 = arith.constant 0 : i32
    %c0_i32_1 = arith.constant 0 : i32
    return %c0_i32, %c0_i32_0 : i32, i32
  }
  func.func @transform_4(%arg0: i32) -> (i32, i32) {
    %c0_i32 = arith.constant 0 : i32
    %c0_i32_0 = arith.constant 0 : i32
    %c0_i32_1 = arith.constant 0 : i32
    return %c0_i32, %c0_i32_0 : i32, i32
  }
  func.func @transform_5(%arg0: i32) -> (i32, i32) {
    %c0_i32 = arith.constant 0 : i32
    %c0_i32_0 = arith.constant 0 : i32
    %c0_i32_1 = arith.constant 0 : i32
    return %c0_i32, %c0_i32_0 : i32, i32
  }
  func.func @transform_6(%arg0: i32) -> (i32, i32) {
    %c0_i32 = arith.constant 0 : i32
    %c0_i32_0 = arith.constant 0 : i32
    %c0_i32_1 = arith.constant 0 : i32
    return %c0_i32, %c0_i32_0 : i32, i32
  }
  func.func @transform_7(%arg0: i32) -> (i32, i32) {
    %c0_i32 = arith.constant 0 : i32
    %c0_i32_0 = arith.constant 0 : i32
    %c0_i32_1 = arith.constant 0 : i32
    return %c0_i32, %c0_i32_0 : i32, i32
  }
  func.func @transform_8(%arg0: i32) -> (i32, i32) {
    %c0_i32 = arith.constant 0 : i32
    %c0_i32_0 = arith.constant 0 : i32
    %c0_i32_1 = arith.constant 0 : i32
    return %c0_i32, %c0_i32_0 : i32, i32
  }
  func.func @transform_9(%arg0: i32) -> (i32, i32) {
    %c0_i32 = arith.constant 0 : i32
    %c0_i32_0 = arith.constant 0 : i32
    return %arg0, %c0_i32 : i32, i32
  }
}

</mosaic_0001>

<bundles_post_ra>
// kernel: tile.18
= control target key start
LH: loop header
LB: loop body
LE: loop exit
PB: predicated region body
PF: predicated region fallthrough
CT: control target
= control target key end

     0   :  { %s28_s0 = inlined_call_operand.vmem [shape: f32[32], index: 0, kind: input, shape index: {}]   ;;  %s29_s1 = inlined_call_operand.vmem [shape: f32[16,32], index: 1, kind: output, shape index: {}]  }
   0x1   :  { %v4_v0 = vld [vmem:[%s28_s0] ss:$0 sm:$0xff] }
   0x2   :  { %5 = vst [vmem:[%s29_s1] sm:$0xff] %v4_v0  ;;  %8 = vst [vmem:[%s29_s1 + $0x8] sm:$0xff] %v4_v0 }

// kernel: tile.19
= control target key start
LH: loop header
LB: loop body
LE: loop exit
PB: predicated region body
PF: predicated region fallthrough
CT: control target
= control target key end

     0   :  { %s57_s8 = smov 96   ;;  %vm3_vm0 = vcmask 261120   ;;  %s59_s15 = smov 64   ;;  %vm9_vm1 = vcmask 1048320   ;;  %vm15_vm2 = vcmask 785920   ;;  %vm21_vm3 = vcmask 523520   ;;  %s94_s0 = inlined_call_operand.vmem [shape: f32[16,32], index: 0, kind: input, shape index: {}]   ;;  %s95_s1 = inlined_call_operand.vmem [shape: f32[1,512], index: 1, kind: output, shape index: {}]  }
   0x1   :  { %v48_v0 = vld [vmem:[%s94_s0 + $0x3] ss:$4 sm:$0xf]   ;;  %v49_v1 = vld [vmem:[%s94_s0 + $0x2] ss:$4 sm:$0xf]  }
   0x2   :  { %7 = vrot.lane.b32.xlu0 %v48_v0, %s57_s8  ;;  %v50_v2 = vld [vmem:[%s94_s0 + $0x1] ss:$4 sm:$0xf]   ;;  %v2_v3 = vld [vmem:[%s94_s0] ss:$4 sm:$0xf]  }
   0x3   :  { %s58_s0 = smov 32   ;;  %4 = vst.msk [vmem:[#allocation0] ss:$8 sm:$0xf] %vm3_vm0, %v2_v3  }
   0x4   :  { %19 = vrot.lane.b32.xlu1 %v50_v2, %s58_s0 }
   0x6   :  { %13 = vrot.lane.b32.xlu0 %v49_v1, %s59_s15 }
  0x74   :  { %v8_v4 = vpop.permute.xlu0 %7  }
  0x75   :  { %10 = vst.msk [vmem:[#allocation0] ss:$8 sm:$0xf] %vm9_vm1, %v8_v4  }
  0x76   :  { %v20_v5 = vpop.permute.xlu1 %19  }
  0x78   :  { %v14_v6 = vpop.permute.xlu0 %13  }
  0x79   :  { %16 = vst.msk [vmem:[#allocation0] ss:$8 sm:$0xf] %vm15_vm2, %v14_v6  }
  0x7a   :  { %22 = vst.msk [vmem:[#allocation0] ss:$8 sm:$0xf] %vm21_vm3, %v20_v5  }
  0x81   :  { %v26_v7 = vld [vmem:[#allocation0] sm:$0x1]  ;;  %v30_v8 = vld [vmem:[#allocation0 + $0x8] sm:$0x1]  ;;  %v35_v9 = vld [vmem:[#allocation0 + $0x10] sm:$0x1] }
  0x82   :  { %28 = vst [vmem:[%s95_s1] sm:$0x1] %v26_v7  ;;  %51 = vst [vmem:[%s95_s1 + $0x1] sm:$0x1] %v30_v8  ;;  %v41_v10 = vld [vmem:[#allocation0 + $0x18] sm:$0x1] }
  0x83   :  { %52 = vst [vmem:[%s95_s1 + $0x2] sm:$0x1] %v35_v9  ;;  %53 = vst [vmem:[%s95_s1 + $0x3] sm:$0x1] %v41_v10 }

// kernel: tile.28
= control target key start
LH: loop header
LB: loop body
LE: loop exit
PB: predicated region body
PF: predicated region fallthrough
CT: control target
= control target key end

     0   :  { %s28_s0 = inlined_call_operand.vmem [shape: f32[16], index: 0, kind: input, shape index: {}]   ;;  %s29_s1 = inlined_call_operand.vmem [shape: f32[16,16], index: 1, kind: output, shape index: {}]  }
   0x1   :  { %v4_v0 = vld [vmem:[%s28_s0] ss:$0 sm:$0xff] }
   0x2   :  { %5 = vst [vmem:[%s29_s1] sm:$0xff] %v4_v0  ;;  %8 = vst [vmem:[%s29_s1 + $0x8] sm:$0xff] %v4_v0 }

// kernel: tile.29
= control target key start
LH: loop header
LB: loop body
LE: loop exit
PB: predicated region body
PF: predicated region fallthrough
CT: control target
= control target key end

     0   :  { %s7_s6 = smov 3  ;;  %s21_s9 = smov 3  ;;  %vm4_vm0 = vcmask 130048   ;;  %vm11_vm1 = vcmask 1048448   ;;  %vm18_vm2 = vcmask 917248   ;;  %vm25_vm3 = vcmask 786048   ;;  %s128_s0 = inlined_call_operand.vmem [shape: f32[16,16], index: 0, kind: input, shape index: {}]   ;;  %s129_s1 = inlined_call_operand.vmem [shape: f32[1,256], index: 1, kind: output, shape index: {}]  }
   0x1   :  { %v66_v0 = vld [vmem:[%s128_s0 + $0x7] ss:$8 sm:%s7_s6]   ;;  %s81_s10 = smov 112   ;;  %v68_v1 = vld [vmem:[%s128_s0 + $0x5] ss:$8 sm:%s21_s9]   ;;  %s14_s13 = smov 3 }
   0x2   :  { %9 = vrot.lane.b32.xlu0 %v66_v0, %s81_s10  ;;  %s82_s14 = smov 80   ;;  %v67_v2 = vld [vmem:[%s128_s0 + $0x6] ss:$8 sm:%s14_s13]   ;;  %s28_s17 = smov 3  ;;  %vm32_vm4 = vcmask 654848   ;;  %vm39_vm5 = vcmask 523648  }
   0x3   :  { %23 = vrot.lane.b32.xlu1 %v68_v1, %s82_s14  ;;  %v69_v3 = vld [vmem:[%s128_s0 + $0x4] ss:$8 sm:%s28_s17]   ;;  %s35_s20 = smov 3  ;;  %s42_s21 = smov 3  ;;  %vm46_vm6 = vcmask 392448   ;;  %vm53_vm7 = vcmask 261248  }
   0x4   :  { %s83_s22 = smov 96   ;;  %s84_s23 = smov 64   ;;  %v70_v4 = vld [vmem:[%s128_s0 + $0x3] ss:$8 sm:%s35_s20]   ;;  %v71_v5 = vld [vmem:[%s128_s0 + $0x2] ss:$8 sm:%s42_s21]  }
   0x5   :  { %s2_s26 = smov 3  ;;  %s49_s29 = smov 3 }
   0x6   :  { %16 = vrot.lane.b32.xlu0 %v67_v2, %s83_s22  ;;  %v3_v6 = vld [vmem:[%s128_s0] ss:$8 sm:%s2_s26]   ;;  %s85_s3 = smov 48   ;;  %s86_s4 = smov 32  }
   0x7   :  { %30 = vrot.lane.b32.xlu1 %v69_v3, %s84_s23  ;;  %5 = vst.msk [vmem:[#allocation0] ss:$8 sm:$0x3] %vm4_vm0, %v3_v6   ;;  %v72_v7 = vld [vmem:[%s128_s0 + $0x1] ss:$8 sm:%s49_s29]   ;;  %s87_s0 = smov 16  }
   0xa   :  { %37 = vrot.lane.b32.xlu0 %v70_v4, %s85_s3 }
   0xb   :  { %44 = vrot.lane.b32.xlu1 %v71_v5, %s86_s4 }
   0xe   :  { %51 = vrot.lane.b32.xlu0 %v72_v7, %s87_s0 }
  0x74   :  { %v10_v8 = vpop.permute.xlu0 %9  }
  0x75   :  { %12 = vst.msk [vmem:[#allocation0] ss:$8 sm:$0x3] %vm11_vm1, %v10_v8   ;;  %v24_v9 = vpop.permute.xlu1 %23  }
  0x78   :  { %v17_v10 = vpop.permute.xlu0 %16  }
  0x79   :  { %19 = vst.msk [vmem:[#allocation0] ss:$8 sm:$0x3] %vm18_vm2, %v17_v10   ;;  %v31_v11 = vpop.permute.xlu1 %30  }
  0x7a   :  { %26 = vst.msk [vmem:[#allocation0] ss:$8 sm:$0x3] %vm25_vm3, %v24_v9  }
  0x7b   :  { %33 = vst.msk [vmem:[#allocation0] ss:$8 sm:$0x3] %vm32_vm4, %v31_v11  }
  0x7c   :  { %v38_v12 = vpop.permute.xlu0 %37  }
  0x7d   :  { %40 = vst.msk [vmem:[#allocation0] ss:$8 sm:$0x3] %vm39_vm5, %v38_v12   ;;  %v45_v13 = vpop.permute.xlu1 %44  }
  0x7e   :  { %47 = vst.msk [vmem:[#allocation0] ss:$8 sm:$0x3] %vm46_vm6, %v45_v13  }
  0x80   :  { %v52_v14 = vpop.permute.xlu0 %51  }
  0x81   :  { %54 = vst.msk [vmem:[#allocation0] ss:$8 sm:$0x3] %vm53_vm7, %v52_v14  }
  0x88   :  { %v58_v15 = vld [vmem:[#allocation0] sm:$0x1]  ;;  %v62_v16 = vld [vmem:[#allocation0 + $0x8] sm:$0x1] }
  0x89   :  { %60 = vst [vmem:[%s129_s1] sm:$0x1] %v58_v15  ;;  %73 = vst [vmem:[%s129_s1 + $0x1] sm:$0x1] %v62_v16 }

// kernel: fully_connected_mse_forward.1
= control target key start
LH: loop header
LB: loop body
LE: loop exit
PB: predicated region body
PF: predicated region fallthrough
CT: control target
= control target key end

     0   :  { %v1771_v3 = vmov 0.0   ;;  %vm1221_vm0 = vcmask 130048   ;;  %s3331_s2 = inlined_call_operand.vmem [shape: f32[128,512], index: 2, kind: input, shape index: {}]   ;;  %s3332_s4 = inlined_call_operand.vmem [shape: f32[512,512], index: 4, kind: input, shape index: {}]   ;;  %s3333_s0 = inlined_call_operand.vmem [shape: f32[8,128], index: 0, kind: input, shape index: {}]   ;;  %s3334_s3 = inlined_call_operand.vmem [shape: f32[1,512], index: 3, kind: input, shape index: {}]   ;;  %s3335_s6 = inlined_call_operand.vmem [shape: f32[512,256], index: 6, kind: input, shape index: {}]   ;;  %s3336_s8 = inlined_call_operand.vmem [shape: f32[256,16], index: 8, kind: input, shape index: {}]   ;;  %s3337_s5 = inlined_call_operand.vmem [shape: f32[1,512], index: 5, kind: input, shape index: {}]   ;;  %s3338_s7 = inlined_call_operand.vmem [shape: f32[1,256], index: 7, kind: input, shape index: {}]   ;;  %s3339_s1 = inlined_call_operand.vmem [shape: f32[8,256], index: 1, kind: input, shape index: {}]   ;;  %s3340_s9 = inlined_call_operand.vmem [shape: f32[8,16], index: 9, kind: output, shape index: {}]  }
   0x1   :  { %v34_v0 = vld [vmem:[%s3331_s2 + $0x8] sm:$0xff]  ;;  %v33_v2 = vld [vmem:[%s3331_s2] sm:$0xff]  ;;  %183 = vmatprep.mubr.f32.mxu1 %v1771_v3  ;;  %v36_v58 = vld [vmem:[%s3331_s2 + $0x18] sm:$0xff] }
   0x2   :  { %v38_v1 = vld [vmem:[%s3331_s2 + $0x28] sm:$0xff]  ;;  %v37_v5 = vld [vmem:[%s3331_s2 + $0x20] sm:$0xff]  ;;  %v40_v59 = vld [vmem:[%s3331_s2 + $0x38] sm:$0xff] }
   0x3   :  { %v1262_v4 = vpack.c.bf16 %v38_v1, %v34_v0  ;;  %v42_v6 = vld [vmem:[%s3331_s2 + $0x48] sm:$0xff]  ;;  %v1264_v8 = vpack.c.bf16 %v37_v5, %v33_v2  ;;  %v41_v10 = vld [vmem:[%s3331_s2 + $0x40] sm:$0xff]  ;;  %v1294_v5 = vpack.c.bf16 %v40_v59, %v36_v58  ;;  %v76_v58 = vld [vmem:[%s3331_s2 + $0x158] sm:$0xff] }
   0x4   :  { %v46_v7 = vld [vmem:[%s3331_s2 + $0x68] sm:$0xff]  ;;  %v45_v11 = vld [vmem:[%s3331_s2 + $0x60] sm:$0xff]  ;;  %v80_v59 = vld [vmem:[%s3331_s2 + $0x178] sm:$0xff] }
   0x5   :  { %v1266_v9 = vpack.c.bf16 %v46_v7, %v42_v6  ;;  %v50_v12 = vld [vmem:[%s3331_s2 + $0x88] sm:$0xff]  ;;  %1263 = vmatprep.subr.bf16.mxu1 %v1262_v4  ;;  %v1268_v14 = vpack.c.bf16 %v45_v11, %v41_v10  ;;  %v49_v16 = vld [vmem:[%s3331_s2 + $0x80] sm:$0xff]  ;;  %v35_v6 = vld [vmem:[%s3331_s2 + $0x10] sm:$0xff] }
   0x6   :  { %v54_v13 = vld [vmem:[%s3331_s2 + $0xa8] sm:$0xff]  ;;  %1265 = vmatpush1.bf16.msra.mxu1 %v1264_v8  ;;  %v53_v17 = vld [vmem:[%s3331_s2 + $0xa0] sm:$0xff]  ;;  %v39_v7 = vld [vmem:[%s3331_s2 + $0x30] sm:$0xff] }
   0x7   :  { %1267 = vmatprep.subr.bf16.mxu1 %v1266_v9  ;;  %v1270_v15 = vpack.c.bf16 %v54_v13, %v50_v12  ;;  %v58_v18 = vld [vmem:[%s3331_s2 + $0xc8] sm:$0xff]  ;;  %v1272_v20 = vpack.c.bf16 %v53_v17, %v49_v16  ;;  %v57_v22 = vld [vmem:[%s3331_s2 + $0xc0] sm:$0xff]  ;;  %v44_v9 = vld [vmem:[%s3331_s2 + $0x58] sm:$0xff]  ;;  %v1296_v17 = vpack.c.bf16 %v39_v7, %v35_v6 }
   0x8   :  { %v62_v19 = vld [vmem:[%s3331_s2 + $0xe8] sm:$0xff]  ;;  %v61_v23 = vld [vmem:[%s3331_s2 + $0xe0] sm:$0xff]  ;;  %v48_v10 = vld [vmem:[%s3331_s2 + $0x78] sm:$0xff] }
   0x9   :  { %v1274_v21 = vpack.c.bf16 %v62_v19, %v58_v18  ;;  %v66_v24 = vld [vmem:[%s3331_s2 + $0x108] sm:$0xff]  ;;  %v1276_v26 = vpack.c.bf16 %v61_v23, %v57_v22  ;;  %v65_v28 = vld [vmem:[%s3331_s2 + $0x100] sm:$0xff]  ;;  %v47_v22 = vld [vmem:[%s3331_s2 + $0x70] sm:$0xff] }
   0xa   :  { %1269 = vmatpush1.bf16.msra.mxu1 %v1268_v14  ;;  %v70_v25 = vld [vmem:[%s3331_s2 + $0x128] sm:$0xff]  ;;  %v69_v29 = vld [vmem:[%s3331_s2 + $0x120] sm:$0xff]  ;;  %v52_v23 = vld [vmem:[%s3331_s2 + $0x98] sm:$0xff] }
   0xb   :  { %1271 = vmatprep.subr.bf16.mxu1 %v1270_v15  ;;  %v1278_v27 = vpack.c.bf16 %v70_v25, %v66_v24  ;;  %v74_v30 = vld [vmem:[%s3331_s2 + $0x148] sm:$0xff]  ;;  %v1280_v32 = vpack.c.bf16 %v69_v29, %v65_v28  ;;  %v73_v34 = vld [vmem:[%s3331_s2 + $0x140] sm:$0xff]  ;;  %v56_v24 = vld [vmem:[%s3331_s2 + $0xb8] sm:$0xff] }
   0xc   :  { %v78_v31 = vld [vmem:[%s3331_s2 + $0x168] sm:$0xff]  ;;  %v77_v35 = vld [vmem:[%s3331_s2 + $0x160] sm:$0xff]  ;;  %v79_v6 = vld [vmem:[%s3331_s2 + $0x170] sm:$0xff] }
   0xd   :  { %v1282_v33 = vpack.c.bf16 %v78_v31, %v74_v30  ;;  %v82_v36 = vld [vmem:[%s3331_s2 + $0x188] sm:$0xff]  ;;  %v1284_v38 = vpack.c.bf16 %v77_v35, %v73_v34  ;;  %v81_v40 = vld [vmem:[%s3331_s2 + $0x180] sm:$0xff]  ;;  %v55_v34 = vld [vmem:[%s3331_s2 + $0xb0] sm:$0xff] }
   0xe   :  { %1273 = vmatpush1.bf16.msra.mxu1 %v1272_v20  ;;  %v86_v37 = vld [vmem:[%s3331_s2 + $0x1a8] sm:$0xff]  ;;  %v85_v41 = vld [vmem:[%s3331_s2 + $0x1a0] sm:$0xff]  ;;  %v1298_v20 = vpack.c.bf16 %v48_v10, %v44_v9  ;;  %v64_v35 = vld [vmem:[%s3331_s2 + $0xf8] sm:$0xff] }
   0xf   :  { %1275 = vmatprep.subr.bf16.mxu1 %v1274_v21  ;;  %v1286_v39 = vpack.c.bf16 %v86_v37, %v82_v36  ;;  %v266_v42 = vld [vmem:[%s3332_s4 + $0x8] sm:$0xff]  ;;  %v265_v47 = vld [vmem:[%s3332_s4] sm:$0xff]  ;;  %v1288_v49 = vpack.c.bf16 %v85_v41, %v81_v40  ;;  %v43_v21 = vld [vmem:[%s3331_s2 + $0x50] sm:$0xff] }
  0x10   :  { %v90_v43 = vld [vmem:[%s3331_s2 + $0x1c8] sm:$0xff]  ;;  %v269_v48 = vld [vmem:[%s3332_s4 + $0x20] sm:$0xff]  ;;  %v1300_v29 = vpack.c.bf16 %v47_v22, %v43_v21  ;;  %v84_v7 = vld [vmem:[%s3331_s2 + $0x198] sm:$0xff] }
  0x11   :  { %v94_v44 = vld [vmem:[%s3331_s2 + $0x1e8] sm:$0xff]  ;;  %v1328_v50 = vpack.c.bf16 %v269_v48, %v265_v47  ;;  %v89_v54 = vld [vmem:[%s3331_s2 + $0x1c0] sm:$0xff]  ;;  %v72_v47 = vld [vmem:[%s3331_s2 + $0x138] sm:$0xff] }
  0x12   :  { %1277 = vmatpush1.bf16.msra.mxu1 %v1276_v26  ;;  %v270_v45 = vld [vmem:[%s3332_s4 + $0x28] sm:$0xff]  ;;  %v1290_v53 = vpack.c.bf16 %v94_v44, %v90_v43  ;;  %v93_v55 = vld [vmem:[%s3331_s2 + $0x1e0] sm:$0xff]  ;;  %v59_v44 = vld [vmem:[%s3331_s2 + $0xd0] sm:$0xff] }
  0x13   :  { %1279 = vmatprep.subr.bf16.mxu1 %v1278_v27  ;;  %v1326_v46 = vpack.c.bf16 %v270_v45, %v266_v42  ;;  %v274_v51 = vld [vmem:[%s3332_s4 + $0x48] sm:$0xff]  ;;  %v273_v57 = vld [vmem:[%s3332_s4 + $0x40] sm:$0xff]  ;;  %v1292_v0 = vpack.c.bf16 %v93_v55, %v89_v54  ;;  %v63_v45 = vld [vmem:[%s3331_s2 + $0xf0] sm:$0xff] }
  0x14   :  { %v278_v52 = vld [vmem:[%s3332_s4 + $0x68] sm:$0xff]  ;;  %v277_v60 = vld [vmem:[%s3332_s4 + $0x60] sm:$0xff]  ;;  %v96_v21 = vld [vmem:[%s3331_s2 + $0x1f8] sm:$0xff] }
  0x15   :  { %1327 = vmatprep.subr.bf16.mxu0 %v1326_v46  ;;  %v1330_v56 = vpack.c.bf16 %v278_v52, %v274_v51  ;;  %v1332_v61 = vpack.c.bf16 %v277_v60, %v273_v57  ;;  %v282_v62 = vld [vmem:[%s3332_s4 + $0x88] sm:$0xff]  ;;  %v281_v2 = vld [vmem:[%s3332_s4 + $0x80] sm:$0xff]  ;;  %v68_v46 = vld [vmem:[%s3331_s2 + $0x118] sm:$0xff]  ;;  %v1308_v52 = vpack.c.bf16 %v63_v45, %v59_v44 }
  0x16   :  { %1281 = vmatpush1.bf16.msra.mxu1 %v1280_v32  ;;  %1329 = vmatpush1.bf16.msra.mxu0 %v1328_v50  ;;  %v286_v63 = vld [vmem:[%s3332_s4 + $0xa8] sm:$0xff]  ;;  %v285_v4 = vld [vmem:[%s3332_s4 + $0xa0] sm:$0xff]  ;;  %v1302_v32 = vpack.c.bf16 %v56_v24, %v52_v23  ;;  %v1310_v55 = vpack.c.bf16 %v72_v47, %v68_v46  ;;  %v71_v57 = vld [vmem:[%s3331_s2 + $0x130] sm:$0xff] }
  0x17   :  { %1283 = vmatprep.subr.bf16.mxu1 %v1282_v33  ;;  %1331 = vmatprep.subr.bf16.mxu0 %v1330_v56  ;;  %v1334_v1 = vpack.c.bf16 %v286_v63, %v282_v62  ;;  %v290_v8 = vld [vmem:[%s3332_s4 + $0xc8] sm:$0xff]  ;;  %v1336_v11 = vpack.c.bf16 %v285_v4, %v281_v2  ;;  %v289_v14 = vld [vmem:[%s3332_s4 + $0xc0] sm:$0xff]  ;;  %v51_v33 = vld [vmem:[%s3331_s2 + $0x90] sm:$0xff]  ;;  %v1314_v4 = vpack.c.bf16 %v80_v59, %v76_v58 }
  0x18   :  { %v294_v12 = vld [vmem:[%s3332_s4 + $0xe8] sm:$0xff]  ;;  %v293_v15 = vld [vmem:[%s3332_s4 + $0xe0] sm:$0xff]  ;;  %v1304_v40 = vpack.c.bf16 %v55_v34, %v51_v33  ;;  %v67_v56 = vld [vmem:[%s3331_s2 + $0x110] sm:$0xff] }
  0x19   :  { %v1338_v13 = vpack.c.bf16 %v294_v12, %v290_v8  ;;  %v1988_v16 = vld [vmem:[%s3333_s0] sm:$0xff]  ;;  %v298_v18 = vld [vmem:[%s3332_s4 + $0x108] sm:$0xff]  ;;  %v1340_v25 = vpack.c.bf16 %v293_v15, %v289_v14  ;;  %v88_v8 = vld [vmem:[%s3331_s2 + $0x1b8] sm:$0xff] }
  0x1a   :  { %1285 = vmatpush1.bf16.msra.mxu1 %v1284_v38  ;;  %1333 = vmatpush1.bf16.msra.mxu0 %v1332_v61  ;;  %v302_v19 = vld [vmem:[%s3332_s4 + $0x128] sm:$0xff]  ;;  %v297_v27 = vld [vmem:[%s3332_s4 + $0x100] sm:$0xff]  ;;  %v272_v33 = vld [vmem:[%s3332_s4 + $0x38] sm:$0xff] }
  0x1b   :  { %1287 = vmatprep.subr.bf16.mxu1 %v1286_v39  ;;  %1335 = vmatprep.subr.bf16.mxu0 %v1334_v1  ;;  %v1342_v26 = vpack.c.bf16 %v302_v19, %v298_v18  ;;  %v301_v28 = vld [vmem:[%s3332_s4 + $0x120] sm:$0xff]  ;;  %v306_v30 = vld [vmem:[%s3332_s4 + $0x148] sm:$0xff]  ;;  %v83_v18 = vld [vmem:[%s3331_s2 + $0x190] sm:$0xff] }
  0x1c   :  { %v310_v31 = vld [vmem:[%s3332_s4 + $0x168] sm:$0xff]  ;;  %v1344_v36 = vpack.c.bf16 %v301_v28, %v297_v27  ;;  %v305_v38 = vld [vmem:[%s3332_s4 + $0x140] sm:$0xff]  ;;  %v87_v19 = vld [vmem:[%s3331_s2 + $0x1b0] sm:$0xff] }
  0x1d   :  { %v1346_v37 = vpack.c.bf16 %v310_v31, %v306_v30  ;;  %v309_v39 = vld [vmem:[%s3332_s4 + $0x160] sm:$0xff]  ;;  %v314_v41 = vld [vmem:[%s3332_s4 + $0x188] sm:$0xff]  ;;  %v91_v30 = vld [vmem:[%s3331_s2 + $0x1d0] sm:$0xff] }
  0x1e   :  { %1289 = vmatpush1.bf16.msra.mxu1 %v1288_v49  ;;  %1337 = vmatpush1.bf16.msra.mxu0 %v1336_v11  ;;  %v318_v42 = vld [vmem:[%s3332_s4 + $0x1a8] sm:$0xff]  ;;  %v1348_v48 = vpack.c.bf16 %v309_v39, %v305_v38  ;;  %v313_v50 = vld [vmem:[%s3332_s4 + $0x180] sm:$0xff]  ;;  %v95_v31 = vld [vmem:[%s3331_s2 + $0x1f0] sm:$0xff] }
  0x1f   :  { %1291 = vmatprep.subr.bf16.mxu1 %v1290_v53  ;;  %1339 = vmatprep.subr.bf16.mxu0 %v1338_v13  ;;  %v1350_v49 = vpack.c.bf16 %v318_v42, %v314_v41  ;;  %v317_v51 = vld [vmem:[%s3332_s4 + $0x1a0] sm:$0xff]  ;;  %v322_v53 = vld [vmem:[%s3332_s4 + $0x1c8] sm:$0xff]  ;;  %v267_v41 = vld [vmem:[%s3332_s4 + $0x10] sm:$0xff] }
  0x20   :  { %v326_v54 = vld [vmem:[%s3332_s4 + $0x1e8] sm:$0xff]  ;;  %v1352_v60 = vpack.c.bf16 %v317_v51, %v313_v50  ;;  %v321_v62 = vld [vmem:[%s3332_s4 + $0x1c0] sm:$0xff]  ;;  %v271_v42 = vld [vmem:[%s3332_s4 + $0x30] sm:$0xff] }
  0x21   :  { %v1354_v61 = vpack.c.bf16 %v326_v54, %v322_v53  ;;  %v325_v63 = vld [vmem:[%s3332_s4 + $0x1e0] sm:$0xff]  ;;  %v330_v1 = vld [vmem:[%s3332_s4 + $0x208] sm:$0xff]  ;;  %v280_v44 = vld [vmem:[%s3332_s4 + $0x78] sm:$0xff] }
  0x22   :  { %1293 = vmatpush1.bf16.msra.mxu1 %v1292_v0  ;;  %1341 = vmatpush1.bf16.msra.mxu0 %v1340_v25  ;;  %v1312_v0 = vpack.c.bf16 %v71_v57, %v67_v56  ;;  %v334_v2 = vld [vmem:[%s3332_s4 + $0x228] sm:$0xff]  ;;  %v1356_v9 = vpack.c.bf16 %v325_v63, %v321_v62  ;;  %v329_v11 = vld [vmem:[%s3332_s4 + $0x200] sm:$0xff]  ;;  %v275_v53 = vld [vmem:[%s3332_s4 + $0x50] sm:$0xff] }
  0x23   :  { %1295 = vmatprep.subr.bf16.mxu1 %v1294_v5  ;;  %1343 = vmatprep.subr.bf16.mxu0 %v1342_v26  ;;  %v75_v5 = vld [vmem:[%s3331_s2 + $0x150] sm:$0xff]  ;;  %v1358_v10 = vpack.c.bf16 %v334_v2, %v330_v1  ;;  %v333_v12 = vld [vmem:[%s3332_s4 + $0x220] sm:$0xff]  ;;  %v338_v14 = vld [vmem:[%s3332_s4 + $0x248] sm:$0xff]  ;;  %v1320_v26 = vpack.c.bf16 %v87_v19, %v83_v18 }
  0x24   :  { %v1316_v13 = vpack.c.bf16 %v79_v6, %v75_v5  ;;  %v342_v15 = vld [vmem:[%s3332_s4 + $0x268] sm:$0xff]  ;;  %v1360_v22 = vpack.c.bf16 %v333_v12, %v329_v11  ;;  %v337_v24 = vld [vmem:[%s3332_s4 + $0x240] sm:$0xff]  ;;  %v279_v54 = vld [vmem:[%s3332_s4 + $0x70] sm:$0xff] }
  0x25   :  { %184 = vmatmul.mubr.f32.vlgmr.msra.gmra.mrb[0].mxu1 %v1988_v16  ;;  %v1362_v23 = vpack.c.bf16 %v342_v15, %v338_v14  ;;  %v341_v25 = vld [vmem:[%s3332_s4 + $0x260] sm:$0xff]  ;;  %v346_v27 = vld [vmem:[%s3332_s4 + $0x288] sm:$0xff]  ;;  %v288_v56 = vld [vmem:[%s3332_s4 + $0xb8] sm:$0xff]  ;;  %v1460_v59 = vpack.c.bf16 %v279_v54, %v275_v53 }
  0x26   :  { %1297 = vmatpush1.bf16.msra.mxu1 %v1296_v17  ;;  %254 = vmatprep.mubr.f32.mxu1 %v1771_v3  ;;  %v60_v3 = vld [vmem:[%s3331_s2 + $0xd8] sm:$0xff]  ;;  %v1318_v17 = vpack.c.bf16 %v88_v8, %v84_v7  ;;  %v350_v28 = vld [vmem:[%s3332_s4 + $0x2a8] sm:$0xff]  ;;  %v1364_v34 = vpack.c.bf16 %v341_v25, %v337_v24  ;;  %v353_v47 = vld [vmem:[%s3332_s4 + $0x2c0] sm:$0xff] }
  0x27   :  { %1299 = vmatprep.subr.bf16.mxu1 %v1298_v20  ;;  %v1306_v43 = vpack.c.bf16 %v64_v35, %v60_v3  ;;  %1345 = vmatpush1.bf16.msra.mxu0 %v1344_v36  ;;  %v92_v20 = vld [vmem:[%s3331_s2 + $0x1d8] sm:$0xff]  ;;  %v1366_v3 = vpack.c.bf16 %v350_v28, %v346_v27  ;;  %v345_v35 = vld [vmem:[%s3332_s4 + $0x280] sm:$0xff]  ;;  %v354_v38 = vld [vmem:[%s3332_s4 + $0x2c8] sm:$0xff] }
  0x28   :  { %1347 = vmatprep.subr.bf16.mxu0 %v1346_v37  ;;  %v349_v36 = vld [vmem:[%s3332_s4 + $0x2a0] sm:$0xff]  ;;  %v1324_v37 = vpack.c.bf16 %v95_v31, %v91_v30  ;;  %v358_v39 = vld [vmem:[%s3332_s4 + $0x2e8] sm:$0xff]  ;;  %v287_v62 = vld [vmem:[%s3332_s4 + $0xb0] sm:$0xff] }
  0x29   :  { %v1368_v45 = vpack.c.bf16 %v349_v36, %v345_v35  ;;  %v1370_v46 = vpack.c.bf16 %v358_v39, %v354_v38  ;;  %v362_v50 = vld [vmem:[%s3332_s4 + $0x308] sm:$0xff]  ;;  %v292_v63 = vld [vmem:[%s3332_s4 + $0xd8] sm:$0xff]  ;;  %v291_v2 = vld [vmem:[%s3332_s4 + $0xd0] sm:$0xff] }
  0x2a   :  { %1301 = vmatpush1.bf16.msra.mxu1 %v1300_v29  ;;  %v1322_v29 = vpack.c.bf16 %v96_v21, %v92_v20  ;;  %v366_v51 = vld [vmem:[%s3332_s4 + $0x328] sm:$0xff]  ;;  %v300_v5 = vld [vmem:[%s3332_s4 + $0x118] sm:$0xff]  ;;  %v307_v15 = vld [vmem:[%s3332_s4 + $0x150] sm:$0xff] }
  0x2b   :  { %1303 = vmatprep.subr.bf16.mxu1 %v1302_v32  ;;  %1349 = vmatpush1.bf16.msra.mxu0 %v1348_v48  ;;  %v268_v32 = vld [vmem:[%s3332_s4 + $0x18] sm:$0xff]  ;;  %v357_v48 = vld [vmem:[%s3332_s4 + $0x2e0] sm:$0xff]  ;;  %v1374_v58 = vpack.c.bf16 %v366_v51, %v362_v50  ;;  %v323_v28 = vld [vmem:[%s3332_s4 + $0x1d0] sm:$0xff] }
  0x2c   :  { %1351 = vmatprep.subr.bf16.mxu0 %v1350_v49  ;;  %v1456_v49 = vpack.c.bf16 %v271_v42, %v267_v41  ;;  %v1372_v57 = vpack.c.bf16 %v357_v48, %v353_v47  ;;  %v304_v6 = vld [vmem:[%s3332_s4 + $0x138] sm:$0xff]  ;;  %v339_v39 = vld [vmem:[%s3332_s4 + $0x250] sm:$0xff] }
  0x2d   :  { %v1470_v8 = vpack.c.bf16 %v304_v6, %v300_v5  ;;  %v308_v11 = vld [vmem:[%s3332_s4 + $0x158] sm:$0xff]  ;;  %v355_v51 = vld [vmem:[%s3332_s4 + $0x2d0] sm:$0xff]  ;;  %v373_v5 = vld [vmem:[%s3332_s4 + $0x360] sm:$0xff] }
  0x2e   :  { %1305 = vmatpush1.bf16.msra.mxu1 %v1304_v40  ;;  %v1454_v40 = vpack.c.bf16 %v272_v33, %v268_v32  ;;  %v312_v12 = vld [vmem:[%s3332_s4 + $0x178] sm:$0xff] }
  0x2f   :  { %1307 = vmatprep.subr.bf16.mxu1 %v1306_v43  ;;  %1353 = vmatpush1.bf16.msra.mxu0 %v1352_v60  ;;  %v276_v43 = vld [vmem:[%s3332_s4 + $0x58] sm:$0xff]  ;;  %v1474_v14 = vpack.c.bf16 %v312_v12, %v308_v11  ;;  %v378_v11 = vld [vmem:[%s3332_s4 + $0x388] sm:$0xff] }
  0x30   :  { %1355 = vmatprep.subr.bf16.mxu0 %v1354_v61  ;;  %v283_v61 = vld [vmem:[%s3332_s4 + $0x90] sm:$0xff]  ;;  %v316_v18 = vld [vmem:[%s3332_s4 + $0x198] sm:$0xff]  ;;  %v382_v12 = vld [vmem:[%s3332_s4 + $0x3a8] sm:$0xff] }
  0x31   :  { %v320_v19 = vld [vmem:[%s3332_s4 + $0x1b8] sm:$0xff] }
  0x32   :  { %1309 = vmatpush1.bf16.msra.mxu1 %v1308_v52  ;;  %v1458_v52 = vpack.c.bf16 %v280_v44, %v276_v43  ;;  %v1478_v21 = vpack.c.bf16 %v320_v19, %v316_v18  ;;  %v324_v24 = vld [vmem:[%s3332_s4 + $0x1d8] sm:$0xff]  ;;  %v381_v18 = vld [vmem:[%s3332_s4 + $0x3a0] sm:$0xff] }
  0x33   :  { %1311 = vmatprep.subr.bf16.mxu1 %v1310_v55  ;;  %1357 = vmatpush1.bf16.msra.mxu0 %v1356_v9  ;;  %v284_v55 = vld [vmem:[%s3332_s4 + $0x98] sm:$0xff]  ;;  %v299_v9 = vld [vmem:[%s3332_s4 + $0x110] sm:$0xff] }
  0x34   :  { %1359 = vmatprep.subr.bf16.mxu0 %v1358_v10  ;;  %v1462_v60 = vpack.c.bf16 %v288_v56, %v284_v55  ;;  %v303_v10 = vld [vmem:[%s3332_s4 + $0x130] sm:$0xff]  ;;  %v328_v25 = vld [vmem:[%s3332_s4 + $0x1f8] sm:$0xff] }
  0x35   :  { %v1482_v27 = vpack.c.bf16 %v328_v25, %v324_v24  ;;  %v332_v30 = vld [vmem:[%s3332_s4 + $0x218] sm:$0xff]  ;;  %v390_v25 = vld [vmem:[%s3332_s4 + $0x3e8] sm:$0xff] }
  0x36   :  { %1313 = vmatpush1.bf16.msra.mxu1 %v1312_v0  ;;  %v1464_v0 = vpack.c.bf16 %v287_v62, %v283_v61  ;;  %v336_v31 = vld [vmem:[%s3332_s4 + $0x238] sm:$0xff]  ;;  %v367_v61 = vld [vmem:[%s3332_s4 + $0x330] sm:$0xff] }
  0x37   :  { %1315 = vmatprep.subr.bf16.mxu1 %v1314_v4  ;;  %1361 = vmatpush1.bf16.msra.mxu0 %v1360_v22  ;;  %v295_v4 = vld [vmem:[%s3332_s4 + $0xf0] sm:$0xff]  ;;  %v1486_v33 = vpack.c.bf16 %v336_v31, %v332_v30  ;;  %v340_v35 = vld [vmem:[%s3332_s4 + $0x258] sm:$0xff]  ;;  %v385_v30 = vld [vmem:[%s3332_s4 + $0x3c0] sm:$0xff] }
  0x38   :  { %1363 = vmatprep.subr.bf16.mxu0 %v1362_v23  ;;  %v1468_v7 = vpack.c.bf16 %v295_v4, %v291_v2  ;;  %v315_v22 = vld [vmem:[%s3332_s4 + $0x190] sm:$0xff]  ;;  %v344_v36 = vld [vmem:[%s3332_s4 + $0x278] sm:$0xff]  ;;  %v369_v4 = vld [vmem:[%s3332_s4 + $0x340] sm:$0xff] }
  0x39   :  { %v319_v23 = vld [vmem:[%s3332_s4 + $0x1b0] sm:$0xff]  ;;  %v1490_v38 = vpack.c.bf16 %v344_v36, %v340_v35  ;;  %v348_v41 = vld [vmem:[%s3332_s4 + $0x298] sm:$0xff]  ;;  %v389_v31 = vld [vmem:[%s3332_s4 + $0x3e0] sm:$0xff] }
  0x3a   :  { %1317 = vmatpush1.bf16.msra.mxu1 %v1316_v13  ;;  %v1472_v13 = vpack.c.bf16 %v303_v10, %v299_v9  ;;  %v352_v42 = vld [vmem:[%s3332_s4 + $0x2b8] sm:$0xff]  ;;  %v375_v9 = vld [vmem:[%s3332_s4 + $0x370] sm:$0xff]  ;;  %v394_v35 = vld [vmem:[%s3332_s4 + $0x408] sm:$0xff] }
  0x3b   :  { %1319 = vmatprep.subr.bf16.mxu1 %v1318_v17  ;;  %1365 = vmatpush1.bf16.msra.mxu0 %v1364_v34  ;;  %v311_v17 = vld [vmem:[%s3332_s4 + $0x170] sm:$0xff]  ;;  %v1494_v44 = vpack.c.bf16 %v352_v42, %v348_v41  ;;  %v356_v47 = vld [vmem:[%s3332_s4 + $0x2d8] sm:$0xff]  ;;  %v398_v36 = vld [vmem:[%s3332_s4 + $0x428] sm:$0xff]  ;;  %v99_v41 = vlaneseq }
  0x3c   :  { %1367 = vmatprep.subr.bf16.mxu0 %v1366_v3  ;;  %v1476_v20 = vpack.c.bf16 %v311_v17, %v307_v15  ;;  %v331_v34 = vld [vmem:[%s3332_s4 + $0x210] sm:$0xff]  ;;  %v360_v48 = vld [vmem:[%s3332_s4 + $0x2f8] sm:$0xff]  ;;  %v377_v17 = vld [vmem:[%s3332_s4 + $0x380] sm:$0xff] }
  0x3d   :  { %v335_v3 = vld [vmem:[%s3332_s4 + $0x230] sm:$0xff]  ;;  %v1498_v50 = vpack.c.bf16 %v360_v48, %v356_v47  ;;  %v364_v53 = vld [vmem:[%s3332_s4 + $0x318] sm:$0xff]  ;;  %v2419_v42 = vshrl.u32 %v99_v41, 7 }
  0x3e   :  { %1321 = vmatpush1.bf16.msra.mxu1 %v1320_v26  ;;  %v1480_v26 = vpack.c.bf16 %v319_v23, %v315_v22  ;;  %v368_v54 = vld [vmem:[%s3332_s4 + $0x338] sm:$0xff]  ;;  %v383_v22 = vld [vmem:[%s3332_s4 + $0x3b0] sm:$0xff]  ;;  %v386_v23 = vld [vmem:[%s3332_s4 + $0x3c8] sm:$0xff] }
  0x3f   :  { %1323 = vmatprep.subr.bf16.mxu1 %v1322_v29  ;;  %1369 = vmatpush1.bf16.msra.mxu0 %v1368_v45  ;;  %v327_v29 = vld [vmem:[%s3332_s4 + $0x1f0] sm:$0xff]  ;;  %v1502_v56 = vpack.c.bf16 %v368_v54, %v364_v53  ;;  %v376_v2 = vld [vmem:[%s3332_s4 + $0x378] sm:$0xff]  ;;  %v397_v53 = vld [vmem:[%s3332_s4 + $0x420] sm:$0xff] }
  0x40   :  { %1371 = vmatprep.subr.bf16.mxu0 %v1370_v46  ;;  %v1484_v32 = vpack.c.bf16 %v327_v29, %v323_v28  ;;  %v347_v45 = vld [vmem:[%s3332_s4 + $0x290] sm:$0xff]  ;;  %v384_v15 = vld [vmem:[%s3332_s4 + $0x3b8] sm:$0xff]  ;;  %v1386_v28 = vpack.c.bf16 %v390_v25, %v386_v23  ;;  %v417_v25 = vld [vmem:[%s3332_s4 + $0x4c0] sm:$0xff] }
  0x41   :  { %v351_v46 = vld [vmem:[%s3332_s4 + $0x2b0] sm:$0xff] }
  0x42   :  { %1325 = vmatpush1.bf16.msra.mxu1 %v1324_v37  ;;  %v1488_v37 = vpack.c.bf16 %v335_v3, %v331_v34  ;;  %v391_v34 = vld [vmem:[%s3332_s4 + $0x3f0] sm:$0xff] }
  0x43   :  { %1455 = vmatprep.subr.bf16.mxu1 %v1454_v40  ;;  %1373 = vmatpush1.bf16.msra.mxu0 %v1372_v57  ;;  %v343_v40 = vld [vmem:[%s3332_s4 + $0x270] sm:$0xff]  ;;  %v361_v57 = vld [vmem:[%s3332_s4 + $0x300] sm:$0xff] }
  0x44   :  { %1375 = vmatprep.subr.bf16.mxu0 %v1374_v58  ;;  %v1492_v43 = vpack.c.bf16 %v343_v40, %v339_v39  ;;  %v365_v58 = vld [vmem:[%s3332_s4 + $0x320] sm:$0xff]  ;;  %v400_v39 = vld [vmem:[%s3332_s4 + $0x438] sm:$0xff]  ;;  %v395_v54 = vld [vmem:[%s3332_s4 + $0x410] sm:$0xff] }
  0x45   :  { %255 = vmatmul.mubr.f32.vlgmr.msra.gmra.mrb[2].mxu1 %v1988_v16  ;;  %v296_v16 = vld [vmem:[%s3332_s4 + $0xf8] sm:$0xff]  ;;  %v431_v41 = vld [vmem:[%s3332_s4 + $0x530] sm:$0xff] }
  0x46   :  { %1457 = vmatpush1.bf16.msra.mxu1 %v1456_v49  ;;  %v1466_v1 = vpack.c.bf16 %v296_v16, %v292_v63  ;;  %v1496_v49 = vpack.c.bf16 %v351_v46, %v347_v45  ;;  %v370_v63 = vld [vmem:[%s3332_s4 + $0x348] sm:$0xff]  ;;  %v2430_v45 = vsub.s32 1, %v2419_v42 }
  0x47   :  { %1459 = vmatprep.subr.bf16.mxu1 %v1458_v52  ;;  %v359_v52 = vld [vmem:[%s3332_s4 + $0x2f0] sm:$0xff]  ;;  %v374_v16 = vld [vmem:[%s3332_s4 + $0x368] sm:$0xff] }
  0x48   :  { %v1500_v55 = vpack.c.bf16 %v359_v52, %v355_v51  ;;  %v393_v52 = vld [vmem:[%s3332_s4 + $0x400] sm:$0xff] }
  0x4a   :  { %1461 = vmatpush1.bf16.msra.mxu1 %v1460_v59  ;;  %v363_v59 = vld [vmem:[%s3332_s4 + $0x310] sm:$0xff] }
  0x4b   :  { %1463 = vmatprep.subr.bf16.mxu1 %v1462_v60  ;;  %v1376_v60 = vpack.c.bf16 %v365_v58, %v361_v57  ;;  %v1504_v62 = vpack.c.bf16 %v367_v61, %v363_v59  ;;  %v406_v57 = vld [vmem:[%s3332_s4 + $0x468] sm:$0xff]  ;;  %v404_v58 = vld [vmem:[%s3332_s4 + $0x458] sm:$0xff] }
  0x4c   :  { %v408_v59 = vld [vmem:[%s3332_s4 + $0x478] sm:$0xff] }
  0x4d   :  { %1377 = vmatpush1.bf16.msra.mxu0 %v1376_v60  ;;  %v1392_v60 = vpack.c.bf16 %v397_v53, %v393_v52  ;;  %v433_v53 = vld [vmem:[%s3332_s4 + $0x540] sm:$0xff] }
  0x4e   :  { %1465 = vmatpush1.bf16.msra.mxu1 %v1464_v0  ;;  %v372_v0 = vld [vmem:[%s3332_s4 + $0x358] sm:$0xff] }
  0x4f   :  { %1467 = vmatprep.subr.bf16.mxu1 %v1466_v1  ;;  %v1378_v1 = vpack.c.bf16 %v374_v16, %v370_v63  ;;  %v1506_v6 = vpack.c.bf16 %v376_v2, %v372_v0  ;;  %v405_v63 = vld [vmem:[%s3332_s4 + $0x460] sm:$0xff]  ;;  %v403_v2 = vld [vmem:[%s3332_s4 + $0x450] sm:$0xff] }
  0x51   :  { %1379 = vmatprep.subr.bf16.mxu0 %v1378_v1  ;;  %v1522_v1 = vpack.c.bf16 %v408_v59, %v404_v58  ;;  %v439_v58 = vld [vmem:[%s3332_s4 + $0x570] sm:$0xff]  ;;  %v442_v59 = vld [vmem:[%s3332_s4 + $0x588] sm:$0xff] }
  0x52   :  { %1469 = vmatpush1.bf16.msra.mxu1 %v1468_v7  ;;  %v1380_v7 = vpack.c.bf16 %v373_v5, %v369_v4  ;;  %v407_v4 = vld [vmem:[%s3332_s4 + $0x470] sm:$0xff]  ;;  %v410_v5 = vld [vmem:[%s3332_s4 + $0x488] sm:$0xff] }
  0x53   :  { %1471 = vmatprep.subr.bf16.mxu1 %v1470_v8  ;;  %v371_v8 = vld [vmem:[%s3332_s4 + $0x350] sm:$0xff] }
  0x54   :  { %v1508_v10 = vpack.c.bf16 %v375_v9, %v371_v8  ;;  %1381 = vmatpush1.bf16.msra.mxu0 %v1380_v7  ;;  %v414_v7 = vld [vmem:[%s3332_s4 + $0x4a8] sm:$0xff]  ;;  %v412_v8 = vld [vmem:[%s3332_s4 + $0x498] sm:$0xff] }
  0x55   :  { %v416_v9 = vld [vmem:[%s3332_s4 + $0x4b8] sm:$0xff] }
  0x56   :  { %1473 = vmatpush1.bf16.msra.mxu1 %v1472_v13  ;;  %v380_v13 = vld [vmem:[%s3332_s4 + $0x398] sm:$0xff] }
  0x57   :  { %1475 = vmatprep.subr.bf16.mxu1 %v1474_v14  ;;  %v1382_v14 = vpack.c.bf16 %v382_v12, %v378_v11  ;;  %v1510_v19 = vpack.c.bf16 %v384_v15, %v380_v13  ;;  %v1524_v11 = vpack.c.bf16 %v407_v4, %v403_v2  ;;  %v409_v12 = vld [vmem:[%s3332_s4 + $0x480] sm:$0xff]  ;;  %v1526_v15 = vpack.c.bf16 %v416_v9, %v412_v8  ;;  %v443_v8 = vld [vmem:[%s3332_s4 + $0x590] sm:$0xff] }
  0x58   :  { %v413_v13 = vld [vmem:[%s3332_s4 + $0x4a0] sm:$0xff]  ;;  %v447_v9 = vld [vmem:[%s3332_s4 + $0x5b0] sm:$0xff] }
  0x59   :  { %1383 = vmatprep.subr.bf16.mxu0 %v1382_v14  ;;  %v1398_v14 = vpack.c.bf16 %v414_v7, %v410_v5  ;;  %v1400_v23 = vpack.c.bf16 %v413_v13, %v409_v12  ;;  %v441_v2 = vld [vmem:[%s3332_s4 + $0x580] sm:$0xff]  ;;  %v454_v12 = vld [vmem:[%s3332_s4 + $0x5e8] sm:$0xff]  ;;  %v452_v13 = vld [vmem:[%s3332_s4 + $0x5d8] sm:$0xff] }
  0x5a   :  { %1477 = vmatpush1.bf16.msra.mxu1 %v1476_v20  ;;  %v1384_v20 = vpack.c.bf16 %v381_v18, %v377_v17  ;;  %v411_v17 = vld [vmem:[%s3332_s4 + $0x490] sm:$0xff]  ;;  %v445_v4 = vld [vmem:[%s3332_s4 + $0x5a0] sm:$0xff] }
  0x5b   :  { %1479 = vmatprep.subr.bf16.mxu1 %v1478_v21  ;;  %v379_v21 = vld [vmem:[%s3332_s4 + $0x390] sm:$0xff] }
  0x5c   :  { %v1512_v24 = vpack.c.bf16 %v383_v22, %v379_v21  ;;  %1385 = vmatpush1.bf16.msra.mxu0 %v1384_v20  ;;  %v415_v18 = vld [vmem:[%s3332_s4 + $0x4b0] sm:$0xff]  ;;  %v422_v20 = vld [vmem:[%s3332_s4 + $0x4e8] sm:$0xff]  ;;  %v420_v21 = vld [vmem:[%s3332_s4 + $0x4d8] sm:$0xff] }
  0x5d   :  { %1387 = vmatprep.subr.bf16.mxu0 %v1386_v28  ;;  %v424_v22 = vld [vmem:[%s3332_s4 + $0x4f8] sm:$0xff] }
  0x5e   :  { %1481 = vmatpush1.bf16.msra.mxu1 %v1480_v26  ;;  %v388_v26 = vld [vmem:[%s3332_s4 + $0x3d8] sm:$0xff]  ;;  %v1530_v28 = vpack.c.bf16 %v424_v22, %v420_v21  ;;  %v451_v22 = vld [vmem:[%s3332_s4 + $0x5d0] sm:$0xff] }
  0x5f   :  { %1483 = vmatprep.subr.bf16.mxu1 %v1482_v27  ;;  %v392_v27 = vld [vmem:[%s3332_s4 + $0x3f8] sm:$0xff] }
  0x60   :  { %v1514_v29 = vpack.c.bf16 %v392_v27, %v388_v26  ;;  %v421_v26 = vld [vmem:[%s3332_s4 + $0x4e0] sm:$0xff] }
  0x62   :  { %1485 = vmatpush1.bf16.msra.mxu1 %v1484_v32  ;;  %v387_v32 = vld [vmem:[%s3332_s4 + $0x3d0] sm:$0xff] }
  0x63   :  { %1487 = vmatprep.subr.bf16.mxu1 %v1486_v33  ;;  %v1388_v33 = vpack.c.bf16 %v389_v31, %v385_v30  ;;  %v1516_v3 = vpack.c.bf16 %v391_v34, %v387_v32  ;;  %v423_v30 = vld [vmem:[%s3332_s4 + $0x4f0] sm:$0xff]  ;;  %v426_v31 = vld [vmem:[%s3332_s4 + $0x508] sm:$0xff]  ;;  %v432_v34 = vld [vmem:[%s3332_s4 + $0x538] sm:$0xff] }
  0x64   :  { %v430_v32 = vld [vmem:[%s3332_s4 + $0x528] sm:$0xff] }
  0x65   :  { %1389 = vmatpush1.bf16.msra.mxu0 %v1388_v33  ;;  %v428_v33 = vld [vmem:[%s3332_s4 + $0x518] sm:$0xff] }
  0x66   :  { %1489 = vmatpush1.bf16.msra.mxu1 %v1488_v37  ;;  %v396_v37 = vld [vmem:[%s3332_s4 + $0x418] sm:$0xff] }
  0x67   :  { %1491 = vmatprep.subr.bf16.mxu1 %v1490_v38  ;;  %v1390_v38 = vpack.c.bf16 %v398_v36, %v394_v35  ;;  %v1518_v40 = vpack.c.bf16 %v400_v39, %v396_v37  ;;  %v425_v36 = vld [vmem:[%s3332_s4 + $0x500] sm:$0xff]  ;;  %v1534_v39 = vpack.c.bf16 %v432_v34, %v428_v33  ;;  %v459_v34 = vld [vmem:[%s3332_s4 + $0x610] sm:$0xff] }
  0x68   :  { %v429_v37 = vld [vmem:[%s3332_s4 + $0x520] sm:$0xff] }
  0x69   :  { %1391 = vmatprep.subr.bf16.mxu0 %v1390_v38  ;;  %v1406_v38 = vpack.c.bf16 %v430_v32, %v426_v31  ;;  %v461_v31 = vld [vmem:[%s3332_s4 + $0x620] sm:$0xff] }
  0x6a   :  { %1493 = vmatpush1.bf16.msra.mxu1 %v1492_v43  ;;  %v2422_v43 = vsub.s32 0, %v2419_v42 }
  0x6b   :  { %1495 = vmatprep.subr.bf16.mxu1 %v1494_v44  ;;  %v2427_v44 = vld [vmem:[%s3334_s3] sm:$0xf] }
  0x6c   :  { %v102_v46 = vrot.slane %v2427_v44, %v2422_v43  ;;  %v106_v47 = vrot.slane %v2427_v44, %v2430_v45 }
  0x6e   :  { %1497 = vmatpush1.bf16.msra.mxu1 %v1496_v49 }
  0x6f   :  { %1499 = vmatprep.subr.bf16.mxu1 %v1498_v50 }
  0x72   :  { %1501 = vmatpush1.bf16.msra.mxu1 %v1500_v55  ;;  %v399_v55 = vld [vmem:[%s3332_s4 + $0x430] sm:$0xff] }
  0x73   :  { %1503 = vmatprep.subr.bf16.mxu1 %v1502_v56  ;;  %v402_v56 = vld [vmem:[%s3332_s4 + $0x448] sm:$0xff]  ;;  %v1520_v61 = vpack.c.bf16 %v399_v55, %v395_v54  ;;  %v437_v54 = vld [vmem:[%s3332_s4 + $0x560] sm:$0xff] }
  0x74   :  { %v1394_v0 = vpack.c.bf16 %v406_v57, %v402_v56  ;;  %v435_v57 = vld [vmem:[%s3332_s4 + $0x550] sm:$0xff] }
  0x76   :  { %1505 = vmatpush1.bf16.msra.mxu1 %v1504_v62  ;;  %v401_v62 = vld [vmem:[%s3332_s4 + $0x440] sm:$0xff] }
  0x77   :  { %1507 = vmatprep.subr.bf16.mxu1 %v1506_v6 }
  0x7a   :  { %1509 = vmatpush1.bf16.msra.mxu1 %v1508_v10  ;;  %v1396_v10 = vpack.c.bf16 %v405_v63, %v401_v62  ;;  %v444_v62 = vld [vmem:[%s3332_s4 + $0x598] sm:$0xff] }
  0x7b   :  { %1511 = vmatprep.subr.bf16.mxu1 %v1510_v19  ;;  %v418_v19 = vld [vmem:[%s3332_s4 + $0x4c8] sm:$0xff]  ;;  %v448_v63 = vld [vmem:[%s3332_s4 + $0x5b8] sm:$0xff] }
  0x7c   :  { %v1402_v27 = vpack.c.bf16 %v422_v20, %v418_v19  ;;  %v1542_v7 = vpack.c.bf16 %v448_v63, %v444_v62  ;;  %v453_v19 = vld [vmem:[%s3332_s4 + $0x5e0] sm:$0xff]  ;;  %v475_v63 = vld [vmem:[%s3332_s4 + $0x690] sm:$0xff] }
  0x7e   :  { %1513 = vmatpush1.bf16.msra.mxu1 %v1512_v24  ;;  %v1528_v24 = vpack.c.bf16 %v415_v18, %v411_v17  ;;  %v1544_v17 = vpack.c.bf16 %v447_v9, %v443_v8  ;;  %v449_v18 = vld [vmem:[%s3332_s4 + $0x5c0] sm:$0xff] }
  0x7f   :  { %1515 = vmatprep.subr.bf16.mxu1 %v1514_v29  ;;  %v419_v29 = vld [vmem:[%s3332_s4 + $0x4d0] sm:$0xff]  ;;  %v481_v8 = vld [vmem:[%s3332_s4 + $0x6c0] sm:$0xff] }
  0x80   :  { %v1532_v35 = vpack.c.bf16 %v423_v30, %v419_v29  ;;  %v457_v30 = vld [vmem:[%s3332_s4 + $0x600] sm:$0xff] }
  0x81   :  { %v485_v9 = vld [vmem:[%s3332_s4 + $0x6e0] sm:$0xff] }
  0x82   :  { %1517 = vmatpush1.bf16.msra.mxu1 %v1516_v3  ;;  %v1404_v3 = vpack.c.bf16 %v421_v26, %v417_v25  ;;  %v462_v25 = vld [vmem:[%s3332_s4 + $0x628] sm:$0xff]  ;;  %v460_v26 = vld [vmem:[%s3332_s4 + $0x618] sm:$0xff] }
  0x83   :  { %1519 = vmatprep.subr.bf16.mxu1 %v1518_v40  ;;  %v427_v40 = vld [vmem:[%s3332_s4 + $0x510] sm:$0xff] }
  0x84   :  { %v1536_v52 = vpack.c.bf16 %v431_v41, %v427_v40  ;;  %v465_v41 = vld [vmem:[%s3332_s4 + $0x640] sm:$0xff] }
  0xf8   :  { %v185_v48 = vpop.f32.mrb[0].mxu1 }
  0xf9   :  { %v186_v49 = vadd.f32 %v185_v48, %v102_v46  ;;  %v187_v50 = vpop.f32.mrb[1].mxu1  ;;  %v434_v46 = vld [vmem:[%s3332_s4 + $0x548] sm:$0xff] }
  0xfa   :  { %v188_v51 = vadd.f32 %v187_v50, %v106_v47  ;;  %v113_v47 = vsub.s32 3, %v2419_v42  ;;  %v438_v48 = vld [vmem:[%s3332_s4 + $0x568] sm:$0xff]  ;;  %v440_v50 = vld [vmem:[%s3332_s4 + $0x578] sm:$0xff] }
  0xfb   :  { %v1410_v55 = vpack.c.bf16 %v438_v48, %v434_v46  ;;  %v469_v46 = vld [vmem:[%s3332_s4 + $0x660] sm:$0xff] }
  0xfc   :  { %1755 = vtanh.f32 %v188_v51  ;;  %v1408_v51 = vpack.c.bf16 %v429_v37, %v425_v36  ;;  %v470_v36 = vld [vmem:[%s3332_s4 + $0x668] sm:$0xff]  ;;  %v468_v37 = vld [vmem:[%s3332_s4 + $0x658] sm:$0xff] }
  0xfd   :  { %1757 = vtanh.f32 %v186_v49  ;;  %v436_v49 = vld [vmem:[%s3332_s4 + $0x558] sm:$0xff] }
  0xfe   :  { %v1538_v56 = vpack.c.bf16 %v440_v50, %v436_v49 }
 0x106   :  { %v1756_v16 = vpop.eup %1755 }
 0x107   :  { %v1758_v6 = vpop.eup %1757  ;;  %607 = vmatprep.mubr.f32.mxu0 %v1756_v16  ;;  %749 = vmatprep.mubr.f32.mxu1 %v1756_v16 }
 0x108   :  { %608 = vmatmul.mubr.f32.vlgmr.msra.gmra.mrb[0].mxu0 %v1758_v6  ;;  %750 = vmatmul.mubr.f32.vlgmr.msra.gmra.mrb[4].mxu1 %v1758_v6 }
 0x109   :  { %1393 = vmatpush1.bf16.msra.mxu0 %v1392_v60  ;;  %1521 = vmatpush1.bf16.msra.mxu1 %v1520_v61  ;;  %v114_v60 = vrot.slane %v2427_v44, %v113_v47  ;;  %v446_v61 = vld [vmem:[%s3332_s4 + $0x5a8] sm:$0xff] }
 0x10a   :  { %1395 = vmatprep.subr.bf16.mxu0 %v1394_v0  ;;  %1523 = vmatprep.subr.bf16.mxu1 %v1522_v1  ;;  %v1412_v0 = vpack.c.bf16 %v437_v54, %v433_v53  ;;  %v1540_v1 = vpack.c.bf16 %v439_v58, %v435_v57  ;;  %v1414_v6 = vpack.c.bf16 %v446_v61, %v442_v59  ;;  %v474_v53 = vld [vmem:[%s3332_s4 + $0x688] sm:$0xff]  ;;  %v473_v59 = vld [vmem:[%s3332_s4 + $0x680] sm:$0xff] }
 0x10b   :  { %v478_v54 = vld [vmem:[%s3332_s4 + $0x6a8] sm:$0xff]  ;;  %v1428_v57 = vpack.c.bf16 %v469_v46, %v465_v41  ;;  %v508_v41 = vld [vmem:[%s3332_s4 + $0x798] sm:$0xff] }
 0x10c   :  { %v1430_v61 = vpack.c.bf16 %v478_v54, %v474_v53  ;;  %v512_v46 = vld [vmem:[%s3332_s4 + $0x7b8] sm:$0xff] }
 0x10d   :  { %1397 = vmatpush1.bf16.msra.mxu0 %v1396_v10  ;;  %1525 = vmatpush1.bf16.msra.mxu1 %v1524_v11  ;;  %v450_v10 = vld [vmem:[%s3332_s4 + $0x5c8] sm:$0xff]  ;;  %v1574_v54 = vpack.c.bf16 %v512_v46, %v508_v41  ;;  %v851_v41 = vld [vmem:[%s3335_s6 + $0xa0] sm:$0xff]  ;;  %v853_v46 = vld [vmem:[%s3335_s6 + $0xb0] sm:$0xff] }
 0x10e   :  { %1399 = vmatprep.subr.bf16.mxu0 %v1398_v14  ;;  %1527 = vmatprep.subr.bf16.mxu1 %v1526_v15  ;;  %v456_v14 = vld [vmem:[%s3332_s4 + $0x5f8] sm:$0xff]  ;;  %v1416_v15 = vpack.c.bf16 %v445_v4, %v441_v2  ;;  %v1418_v20 = vpack.c.bf16 %v454_v12, %v450_v10  ;;  %v486_v2 = vld [vmem:[%s3332_s4 + $0x6e8] sm:$0xff]  ;;  %v483_v12 = vld [vmem:[%s3332_s4 + $0x6d0] sm:$0xff] }
 0x10f   :  { %v1546_v21 = vpack.c.bf16 %v456_v14, %v452_v13  ;;  %v484_v4 = vld [vmem:[%s3332_s4 + $0x6d8] sm:$0xff]  ;;  %v487_v13 = vld [vmem:[%s3332_s4 + $0x6f0] sm:$0xff]  ;;  %v490_v14 = vld [vmem:[%s3332_s4 + $0x708] sm:$0xff] }
 0x111   :  { %1401 = vmatpush1.bf16.msra.mxu0 %v1400_v23  ;;  %1529 = vmatpush1.bf16.msra.mxu1 %v1528_v24  ;;  %v455_v23 = vld [vmem:[%s3332_s4 + $0x5f0] sm:$0xff]  ;;  %v458_v24 = vld [vmem:[%s3332_s4 + $0x608] sm:$0xff] }
 0x112   :  { %1403 = vmatprep.subr.bf16.mxu0 %v1402_v27  ;;  %1531 = vmatprep.subr.bf16.mxu1 %v1530_v28  ;;  %v464_v27 = vld [vmem:[%s3332_s4 + $0x638] sm:$0xff]  ;;  %v1420_v28 = vpack.c.bf16 %v453_v19, %v449_v18  ;;  %v1548_v29 = vpack.c.bf16 %v455_v23, %v451_v22  ;;  %v1422_v32 = vpack.c.bf16 %v462_v25, %v458_v24  ;;  %v489_v22 = vld [vmem:[%s3332_s4 + $0x700] sm:$0xff] }
 0x113   :  { %v1550_v33 = vpack.c.bf16 %v464_v27, %v460_v26  ;;  %v496_v18 = vld [vmem:[%s3332_s4 + $0x738] sm:$0xff]  ;;  %v1436_v19 = vpack.c.bf16 %v485_v9, %v481_v8  ;;  %v493_v23 = vld [vmem:[%s3332_s4 + $0x720] sm:$0xff]  ;;  %v491_v26 = vld [vmem:[%s3332_s4 + $0x710] sm:$0xff] }
 0x114   :  { %v495_v27 = vld [vmem:[%s3332_s4 + $0x730] sm:$0xff] }
 0x115   :  { %1405 = vmatpush1.bf16.msra.mxu0 %v1404_v3  ;;  %1533 = vmatpush1.bf16.msra.mxu1 %v1532_v35  ;;  %v463_v3 = vld [vmem:[%s3332_s4 + $0x630] sm:$0xff]  ;;  %v466_v35 = vld [vmem:[%s3332_s4 + $0x648] sm:$0xff] }
 0x116   :  { %1407 = vmatprep.subr.bf16.mxu0 %v1406_v38  ;;  %1535 = vmatprep.subr.bf16.mxu1 %v1534_v39  ;;  %v472_v38 = vld [vmem:[%s3332_s4 + $0x678] sm:$0xff]  ;;  %v1424_v39 = vpack.c.bf16 %v461_v31, %v457_v30  ;;  %v1552_v40 = vpack.c.bf16 %v463_v3, %v459_v34  ;;  %v1426_v49 = vpack.c.bf16 %v470_v36, %v466_v35  ;;  %v497_v3 = vld [vmem:[%s3332_s4 + $0x740] sm:$0xff] }
 0x117   :  { %v1554_v50 = vpack.c.bf16 %v472_v38, %v468_v37  ;;  %v500_v30 = vld [vmem:[%s3332_s4 + $0x758] sm:$0xff]  ;;  %v1568_v34 = vpack.c.bf16 %v495_v27, %v491_v26  ;;  %v501_v35 = vld [vmem:[%s3332_s4 + $0x760] sm:$0xff]  ;;  %v499_v38 = vld [vmem:[%s3332_s4 + $0x750] sm:$0xff] }
 0x118   :  { %v2584_v16 = vpop.f32.mrb[2].mxu1  ;;  %v504_v31 = vld [vmem:[%s3332_s4 + $0x778] sm:$0xff]  ;;  %v841_v26 = vld [vmem:[%s3335_s6 + $0x50] sm:$0xff]  ;;  %v844_v27 = vld [vmem:[%s3335_s6 + $0x68] sm:$0xff] }
 0x119   :  { %1409 = vmatpush1.bf16.msra.mxu0 %v1408_v51  ;;  %1537 = vmatpush1.bf16.msra.mxu1 %v1536_v52  ;;  %v258_v5 = vpop.f32.mrb[3].mxu1  ;;  %v467_v51 = vld [vmem:[%s3332_s4 + $0x650] sm:$0xff]  ;;  %v1570_v37 = vpack.c.bf16 %v504_v31, %v500_v30  ;;  %v843_v31 = vld [vmem:[%s3335_s6 + $0x60] sm:$0xff] }
 0x11a   :  { %1411 = vmatprep.subr.bf16.mxu0 %v1410_v55  ;;  %1539 = vmatprep.subr.bf16.mxu1 %v1538_v56  ;;  %v259_v11 = vadd.f32 %v258_v5, %v114_v60  ;;  %v471_v52 = vld [vmem:[%s3332_s4 + $0x670] sm:$0xff]  ;;  %v476_v55 = vld [vmem:[%s3332_s4 + $0x698] sm:$0xff]  ;;  %v477_v60 = vld [vmem:[%s3332_s4 + $0x6a0] sm:$0xff] }
 0x11b   :  { %v480_v56 = vld [vmem:[%s3332_s4 + $0x6b8] sm:$0xff]  ;;  %v1556_v58 = vpack.c.bf16 %v471_v52, %v467_v51  ;;  %v505_v51 = vld [vmem:[%s3332_s4 + $0x780] sm:$0xff] }
 0x11c   :  { %1759 = vtanh.f32 %v259_v11  ;;  %v1558_v62 = vpack.c.bf16 %v480_v56, %v476_v55  ;;  %v488_v5 = vld [vmem:[%s3332_s4 + $0x6f8] sm:$0xff]  ;;  %v509_v52 = vld [vmem:[%s3332_s4 + $0x7a0] sm:$0xff]  ;;  %v511_v55 = vld [vmem:[%s3332_s4 + $0x7b0] sm:$0xff] }
 0x11d   :  { %1413 = vmatpush1.bf16.msra.mxu0 %v1412_v0  ;;  %1541 = vmatpush1.bf16.msra.mxu1 %v1540_v1  ;;  %v479_v0 = vld [vmem:[%s3332_s4 + $0x6b0] sm:$0xff]  ;;  %v482_v1 = vld [vmem:[%s3332_s4 + $0x6c8] sm:$0xff]  ;;  %v1562_v11 = vpack.c.bf16 %v488_v5, %v484_v4 }
 0x11e   :  { %1415 = vmatprep.subr.bf16.mxu0 %v1414_v6  ;;  %1543 = vmatprep.subr.bf16.mxu1 %v1542_v7  ;;  %v1432_v6 = vpack.c.bf16 %v477_v60, %v473_v59  ;;  %v1560_v7 = vpack.c.bf16 %v479_v0, %v475_v63  ;;  %v1434_v10 = vpack.c.bf16 %v486_v2, %v482_v1  ;;  %v514_v56 = vld [vmem:[%s3332_s4 + $0x7c8] sm:$0xff]  ;;  %v520_v59 = vld [vmem:[%s3332_s4 + $0x7f8] sm:$0xff]  ;;  %v517_v1 = vld [vmem:[%s3332_s4 + $0x7e0] sm:$0xff] }
 0x11f   :  { %v1448_v60 = vpack.c.bf16 %v509_v52, %v505_v51  ;;  %v515_v2 = vld [vmem:[%s3332_s4 + $0x7d0] sm:$0xff]  ;;  %v832_v5 = vld [vmem:[%s3335_s6 + $0x8] sm:$0xff]  ;;  %v855_v52 = vld [vmem:[%s3335_s6 + $0xc0] sm:$0xff] }
 0x120   :  { %v519_v4 = vld [vmem:[%s3332_s4 + $0x7f0] sm:$0xff] }
 0x121   :  { %1417 = vmatpush1.bf16.msra.mxu0 %v1416_v15  ;;  %1545 = vmatpush1.bf16.msra.mxu1 %v1544_v17  ;;  %v494_v15 = vld [vmem:[%s3332_s4 + $0x728] sm:$0xff]  ;;  %v492_v17 = vld [vmem:[%s3332_s4 + $0x718] sm:$0xff]  ;;  %v1580_v8 = vpack.c.bf16 %v519_v4, %v515_v2 }
 0x122   :  { %1419 = vmatprep.subr.bf16.mxu0 %v1418_v20  ;;  %1547 = vmatprep.subr.bf16.mxu1 %v1546_v21  ;;  %v1564_v20 = vpack.c.bf16 %v487_v13, %v483_v12  ;;  %v109_v21 = vsub.s32 2, %v2419_v42  ;;  %v1438_v24 = vpack.c.bf16 %v494_v15, %v490_v14  ;;  %v1566_v25 = vpack.c.bf16 %v496_v18, %v492_v17  ;;  %v836_v12 = vld [vmem:[%s3335_s6 + $0x28] sm:$0xff]  ;;  %v838_v13 = vld [vmem:[%s3335_s6 + $0x38] sm:$0xff]  ;;  %v835_v17 = vld [vmem:[%s3335_s6 + $0x20] sm:$0xff] }
 0x123   :  { %v1586_v15 = vpack.c.bf16 %v838_v13, %v836_v12  ;;  %v837_v18 = vld [vmem:[%s3335_s6 + $0x30] sm:$0xff]  ;;  %v870_v2 = vld [vmem:[%s3335_s6 + $0x138] sm:$0xff]  ;;  %v871_v12 = vld [vmem:[%s3335_s6 + $0x140] sm:$0xff] }
 0x124   :  { %v873_v13 = vld [vmem:[%s3335_s6 + $0x150] sm:$0xff]  ;;  %v954_v42 = vld [vmem:[%s3335_s6 + $0x3d8] sm:$0xff] }
 0x125   :  { %1421 = vmatpush1.bf16.msra.mxu0 %v1420_v28  ;;  %1549 = vmatpush1.bf16.msra.mxu1 %v1548_v29  ;;  %v498_v28 = vld [vmem:[%s3332_s4 + $0x748] sm:$0xff] }
 0x126   :  { %v1760_v48 = vpop.eup %1759  ;;  %1423 = vmatprep.subr.bf16.mxu0 %v1422_v32  ;;  %1551 = vmatprep.subr.bf16.mxu1 %v1550_v33  ;;  %v502_v29 = vld [vmem:[%s3332_s4 + $0x768] sm:$0xff]  ;;  %v110_v32 = vrot.slane %v2427_v44, %v109_v21  ;;  %v1440_v33 = vpack.c.bf16 %v493_v23, %v489_v22  ;;  %v503_v44 = vld [vmem:[%s3332_s4 + $0x770] sm:$0xff]  ;;  %v842_v22 = vld [vmem:[%s3335_s6 + $0x58] sm:$0xff]  ;;  %v1588_v23 = vpack.c.bf16 %v837_v18, %v835_v17 }
 0x127   :  { %678 = vmatprep.mubr.f32.mxu0 %v1760_v48  ;;  %820 = vmatprep.mubr.f32.mxu1 %v1760_v48  ;;  %v1442_v36 = vpack.c.bf16 %v502_v29, %v498_v28  ;;  %v846_v28 = vld [vmem:[%s3335_s6 + $0x78] sm:$0xff]  ;;  %v1624_v17 = vpack.c.bf16 %v873_v13, %v871_v12  ;;  %v1143_v12 = vld [vmem:[%s3336_s8 + $0xc0] sm:$0xff]  ;;  %v1144_v13 = vld [vmem:[%s3336_s8 + $0xc8] sm:$0xff] }
 0x128   :  { %v257_v48 = vadd.f32 %v2584_v16, %v110_v32  ;;  %v507_v16 = vld [vmem:[%s3332_s4 + $0x790] sm:$0xff]  ;;  %v1594_v30 = vpack.c.bf16 %v846_v28, %v844_v27 }
 0x129   :  { %1425 = vmatpush1.bf16.msra.mxu0 %v1424_v39  ;;  %1553 = vmatpush1.bf16.msra.mxu1 %v1552_v40  ;;  %v506_v39 = vld [vmem:[%s3332_s4 + $0x788] sm:$0xff]  ;;  %v845_v32 = vld [vmem:[%s3335_s6 + $0x70] sm:$0xff] }
 0x12a   :  { %1427 = vmatprep.subr.bf16.mxu0 %v1426_v49  ;;  %1555 = vmatprep.subr.bf16.mxu1 %v1554_v50  ;;  %v510_v40 = vld [vmem:[%s3332_s4 + $0x7a8] sm:$0xff]  ;;  %v1444_v49 = vpack.c.bf16 %v501_v35, %v497_v3  ;;  %v1572_v50 = vpack.c.bf16 %v503_v44, %v499_v38  ;;  %1761 = vtanh.f32 %v257_v48  ;;  %v1596_v3 = vpack.c.bf16 %v845_v32, %v843_v31  ;;  %v854_v44 = vld [vmem:[%s3335_s6 + $0xb8] sm:$0xff]  ;;  %v881_v27 = vld [vmem:[%s3335_s6 + $0x190] sm:$0xff] }
 0x12b   :  { %v1446_v53 = vpack.c.bf16 %v510_v40, %v506_v39  ;;  %v852_v38 = vld [vmem:[%s3335_s6 + $0xa8] sm:$0xff]  ;;  %v883_v32 = vld [vmem:[%s3335_s6 + $0x1a0] sm:$0xff] }
 0x12c   :  { %v1602_v40 = vpack.c.bf16 %v854_v44, %v852_v38  ;;  %v856_v48 = vld [vmem:[%s3335_s6 + $0xc8] sm:$0xff]  ;;  %v889_v38 = vld [vmem:[%s3335_s6 + $0x1d0] sm:$0xff] }
 0x12d   :  { %1429 = vmatpush1.bf16.msra.mxu0 %v1428_v57  ;;  %1557 = vmatpush1.bf16.msra.mxu1 %v1556_v58  ;;  %v518_v57 = vld [vmem:[%s3332_s4 + $0x7e8] sm:$0xff]  ;;  %v516_v58 = vld [vmem:[%s3332_s4 + $0x7d8] sm:$0xff] }
 0x12e   :  { %1431 = vmatprep.subr.bf16.mxu0 %v1430_v61  ;;  %1559 = vmatprep.subr.bf16.mxu1 %v1558_v62  ;;  %v1576_v61 = vpack.c.bf16 %v511_v55, %v507_v16  ;;  %v513_v62 = vld [vmem:[%s3332_s4 + $0x7c0] sm:$0xff]  ;;  %v1450_v63 = vpack.c.bf16 %v518_v57, %v514_v56  ;;  %v1578_v0 = vpack.c.bf16 %v520_v59, %v516_v58  ;;  %v862_v16 = vld [vmem:[%s3335_s6 + $0xf8] sm:$0xff]  ;;  %v861_v58 = vld [vmem:[%s3335_s6 + $0xf0] sm:$0xff] }
 0x12f   :  { %v859_v57 = vld [vmem:[%s3335_s6 + $0xe0] sm:$0xff]  ;;  %v864_v59 = vld [vmem:[%s3335_s6 + $0x108] sm:$0xff] }
 0x130   :  { %v892_v44 = vld [vmem:[%s3335_s6 + $0x1e8] sm:$0xff] }
 0x131   :  { %1433 = vmatpush1.bf16.msra.mxu0 %v1432_v6  ;;  %1561 = vmatpush1.bf16.msra.mxu1 %v1560_v7  ;;  %v834_v6 = vld [vmem:[%s3335_s6 + $0x18] sm:$0xff]  ;;  %v1452_v7 = vpack.c.bf16 %v517_v1, %v513_v62  ;;  %v868_v1 = vld [vmem:[%s3335_s6 + $0x128] sm:$0xff] }
 0x132   :  { %1435 = vmatprep.subr.bf16.mxu0 %v1434_v10  ;;  %1563 = vmatprep.subr.bf16.mxu1 %v1562_v11  ;;  %v1582_v9 = vpack.c.bf16 %v834_v6, %v832_v5  ;;  %v831_v10 = vld [vmem:[%s3335_s6] sm:$0xff]  ;;  %v833_v11 = vld [vmem:[%s3335_s6 + $0x10] sm:$0xff]  ;;  %v1618_v5 = vpack.c.bf16 %v870_v2, %v868_v1 }
 0x133   :  { %v1584_v14 = vpack.c.bf16 %v833_v11, %v831_v10  ;;  %v867_v6 = vld [vmem:[%s3335_s6 + $0x120] sm:$0xff] }
 0x135   :  { %1437 = vmatpush1.bf16.msra.mxu0 %v1436_v19  ;;  %1565 = vmatpush1.bf16.msra.mxu1 %v1564_v20  ;;  %v1762_v19 = vpop.eup %1761  ;;  %v840_v20 = vld [vmem:[%s3335_s6 + $0x48] sm:$0xff] }
 0x136   :  { %1439 = vmatprep.subr.bf16.mxu0 %v1438_v24  ;;  %1567 = vmatprep.subr.bf16.mxu1 %v1566_v25  ;;  %v1590_v24 = vpack.c.bf16 %v842_v22, %v840_v20  ;;  %v839_v25 = vld [vmem:[%s3335_s6 + $0x40] sm:$0xff]  ;;  %v877_v20 = vld [vmem:[%s3335_s6 + $0x170] sm:$0xff]  ;;  %v880_v22 = vld [vmem:[%s3335_s6 + $0x188] sm:$0xff] }
 0x137   :  { %v1592_v29 = vpack.c.bf16 %v841_v26, %v839_v25  ;;  %v879_v26 = vld [vmem:[%s3335_s6 + $0x180] sm:$0xff] }
 0x138   :  { %v1632_v28 = vpack.c.bf16 %v881_v27, %v879_v26  ;;  %v3092_v27 = vld [vmem:[%s3337_s5] sm:$0xf] }
 0x139   :  { %1441 = vmatpush1.bf16.msra.mxu0 %v1440_v33  ;;  %1569 = vmatpush1.bf16.msra.mxu1 %v1568_v34  ;;  %v848_v33 = vld [vmem:[%s3335_s6 + $0x88] sm:$0xff]  ;;  %v850_v34 = vld [vmem:[%s3335_s6 + $0x98] sm:$0xff] }
 0x13a   :  { %1443 = vmatprep.subr.bf16.mxu0 %v1442_v36  ;;  %1571 = vmatprep.subr.bf16.mxu1 %v1570_v37  ;;  %v1598_v35 = vpack.c.bf16 %v850_v34, %v848_v33  ;;  %v847_v36 = vld [vmem:[%s3335_s6 + $0x80] sm:$0xff]  ;;  %v849_v37 = vld [vmem:[%s3335_s6 + $0x90] sm:$0xff] }
 0x13b   :  { %v1600_v39 = vpack.c.bf16 %v849_v37, %v847_v36  ;;  %v885_v33 = vld [vmem:[%s3335_s6 + $0x1b0] sm:$0xff]  ;;  %v887_v36 = vld [vmem:[%s3335_s6 + $0x1c0] sm:$0xff] }
 0x13c   :  { %v1636_v34 = vpack.c.bf16 %v885_v33, %v883_v32 }
 0x13d   :  { %1445 = vmatpush1.bf16.msra.mxu0 %v1444_v49  ;;  %1573 = vmatpush1.bf16.msra.mxu1 %v1572_v50  ;;  %v858_v49 = vld [vmem:[%s3335_s6 + $0xd8] sm:$0xff]  ;;  %v1604_v50 = vpack.c.bf16 %v853_v46, %v851_v41  ;;  %v891_v46 = vld [vmem:[%s3335_s6 + $0x1e0] sm:$0xff] }
 0x13e   :  { %1447 = vmatprep.subr.bf16.mxu0 %v1446_v53  ;;  %1575 = vmatprep.subr.bf16.mxu1 %v1574_v54  ;;  %v1606_v51 = vpack.c.bf16 %v858_v49, %v856_v48  ;;  %v857_v53 = vld [vmem:[%s3335_s6 + $0xd0] sm:$0xff]  ;;  %v860_v54 = vld [vmem:[%s3335_s6 + $0xe8] sm:$0xff] }
 0x13f   :  { %v1608_v55 = vpack.c.bf16 %v857_v53, %v855_v52  ;;  %v1610_v56 = vpack.c.bf16 %v862_v16, %v860_v54  ;;  %v893_v48 = vld [vmem:[%s3335_s6 + $0x1f0] sm:$0xff]  ;;  %v1135_v53 = vld [vmem:[%s3336_s8 + $0x80] sm:$0xff]  ;;  %v1136_v54 = vld [vmem:[%s3336_s8 + $0x88] sm:$0xff] }
 0x140   :  { %v1644_v49 = vpack.c.bf16 %v893_v48, %v891_v46  ;;  %v1119_v16 = vld [vmem:[%s3336_s8] sm:$0xff]  ;;  %v901_v48 = vld [vmem:[%s3335_s6 + $0x230] sm:$0xff] }
 0x141   :  { %1449 = vmatpush1.bf16.msra.mxu0 %v1448_v60  ;;  %1577 = vmatpush1.bf16.msra.mxu1 %v1576_v61  ;;  %v866_v60 = vld [vmem:[%s3335_s6 + $0x118] sm:$0xff]  ;;  %v1612_v61 = vpack.c.bf16 %v861_v58, %v859_v57  ;;  %v1137_v57 = vld [vmem:[%s3336_s8 + $0x90] sm:$0xff]  ;;  %v899_v46 = vld [vmem:[%s3335_s6 + $0x220] sm:$0xff] }
 0x142   :  { %1451 = vmatprep.subr.bf16.mxu0 %v1450_v63  ;;  %1579 = vmatprep.subr.bf16.mxu1 %v1578_v0  ;;  %v1614_v62 = vpack.c.bf16 %v866_v60, %v864_v59  ;;  %v863_v63 = vld [vmem:[%s3335_s6 + $0x100] sm:$0xff]  ;;  %v865_v0 = vld [vmem:[%s3335_s6 + $0x110] sm:$0xff]  ;;  %v1138_v58 = vld [vmem:[%s3336_s8 + $0x98] sm:$0xff] }
 0x143   :  { %v1616_v4 = vpack.c.bf16 %v865_v0, %v863_v63  ;;  %v1714_v60 = vpack.c.bf16 %v1138_v58, %v1137_v57  ;;  %v1139_v63 = vld [vmem:[%s3336_s8 + $0xa0] sm:$0xff]  ;;  %v1140_v0 = vld [vmem:[%s3336_s8 + $0xa8] sm:$0xff]  ;;  %v910_v57 = vld [vmem:[%s3335_s6 + $0x278] sm:$0xff] }
 0x144   :  { %v1718_v2 = vpack.c.bf16 %v1140_v0, %v1139_v63  ;;  %v914_v63 = vld [vmem:[%s3335_s6 + $0x298] sm:$0xff] }
 0x145   :  { %1453 = vmatpush1.bf16.msra.mxu0 %v1452_v7  ;;  %1581 = vmatpush1.bf16.msra.mxu1 %v1580_v8  ;;  %v869_v7 = vld [vmem:[%s3335_s6 + $0x130] sm:$0xff]  ;;  %v872_v8 = vld [vmem:[%s3335_s6 + $0x148] sm:$0xff] }
 0x146   :  { %1583 = vmatprep.subr.bf16.mxu0 %v1582_v9  ;;  %v874_v9 = vld [vmem:[%s3335_s6 + $0x158] sm:$0xff]  ;;  %v1620_v10 = vpack.c.bf16 %v869_v7, %v867_v6  ;;  %v1141_v6 = vld [vmem:[%s3336_s8 + $0xb0] sm:$0xff] }
 0x147   :  { %v1622_v11 = vpack.c.bf16 %v874_v9, %v872_v8  ;;  %v1142_v7 = vld [vmem:[%s3336_s8 + $0xb8] sm:$0xff] }
 0x148   :  { %679 = vmatmul.mubr.f32.vlgmr.msra.gmra.mrb[0].mxu0 %v1762_v19  ;;  %821 = vmatmul.mubr.f32.vlgmr.msra.gmra.mrb[4].mxu1 %v1762_v19  ;;  %v875_v19 = vld [vmem:[%s3335_s6 + $0x160] sm:$0xff]  ;;  %v1722_v9 = vpack.c.bf16 %v1142_v7, %v1141_v6  ;;  %v918_v6 = vld [vmem:[%s3335_s6 + $0x2b8] sm:$0xff] }
 0x149   :  { %1585 = vmatpush1.bf16.msra.mxu0 %v1584_v14  ;;  %v876_v14 = vld [vmem:[%s3335_s6 + $0x168] sm:$0xff] }
 0x14a   :  { %1587 = vmatprep.subr.bf16.mxu0 %v1586_v15  ;;  %v878_v15 = vld [vmem:[%s3335_s6 + $0x178] sm:$0xff] }
 0x14b   :  { %v1626_v18 = vpack.c.bf16 %v878_v15, %v876_v14  ;;  %v1726_v15 = vpack.c.bf16 %v1144_v13, %v1143_v12  ;;  %v922_v12 = vld [vmem:[%s3335_s6 + $0x2d8] sm:$0xff] }
 0x14d   :  { %1589 = vmatpush1.bf16.msra.mxu0 %v1588_v23  ;;  %v882_v23 = vld [vmem:[%s3335_s6 + $0x198] sm:$0xff] }
 0x14e   :  { %1591 = vmatprep.subr.bf16.mxu0 %v1590_v24  ;;  %v1628_v24 = vpack.c.bf16 %v877_v20, %v875_v19  ;;  %v1630_v25 = vpack.c.bf16 %v882_v23, %v880_v22  ;;  %v1145_v19 = vld [vmem:[%s3336_s8 + $0xd0] sm:$0xff]  ;;  %v1146_v20 = vld [vmem:[%s3336_s8 + $0xd8] sm:$0xff] }
 0x14f   :  { %v1730_v23 = vpack.c.bf16 %v1146_v20, %v1145_v19  ;;  %v926_v19 = vld [vmem:[%s3335_s6 + $0x2f8] sm:$0xff] }
 0x151   :  { %1593 = vmatpush1.bf16.msra.mxu0 %v1592_v29  ;;  %v884_v29 = vld [vmem:[%s3335_s6 + $0x1a8] sm:$0xff] }
 0x152   :  { %1595 = vmatprep.subr.bf16.mxu0 %v1594_v30  ;;  %v886_v30 = vld [vmem:[%s3335_s6 + $0x1b8] sm:$0xff] }
 0x153   :  { %v1634_v31 = vpack.c.bf16 %v886_v30, %v884_v29  ;;  %v530_v29 = vrot.slane %v3092_v27, %v2430_v45  ;;  %v538_v30 = vrot.slane %v3092_v27, %v113_v47  ;;  %v900_v47 = vld [vmem:[%s3335_s6 + $0x228] sm:$0xff] }
 0x155   :  { %1597 = vmatpush1.bf16.msra.mxu0 %v1596_v3  ;;  %v888_v3 = vld [vmem:[%s3335_s6 + $0x1c8] sm:$0xff] }
 0x156   :  { %1599 = vmatprep.subr.bf16.mxu0 %v1598_v35  ;;  %v890_v35 = vld [vmem:[%s3335_s6 + $0x1d8] sm:$0xff] }
 0x157   :  { %v1638_v37 = vpack.c.bf16 %v890_v35, %v888_v3 }
 0x159   :  { %1601 = vmatpush1.bf16.msra.mxu0 %v1600_v39  ;;  %v894_v39 = vld [vmem:[%s3335_s6 + $0x1f8] sm:$0xff] }
 0x15a   :  { %1603 = vmatprep.subr.bf16.mxu0 %v1602_v40  ;;  %v1640_v40 = vpack.c.bf16 %v889_v38, %v887_v36  ;;  %v1642_v41 = vpack.c.bf16 %v894_v39, %v892_v44  ;;  %v897_v38 = vld [vmem:[%s3335_s6 + $0x210] sm:$0xff]  ;;  %v902_v44 = vld [vmem:[%s3335_s6 + $0x238] sm:$0xff] }
 0x15d   :  { %1605 = vmatpush1.bf16.msra.mxu0 %v1604_v50  ;;  %v896_v50 = vld [vmem:[%s3335_s6 + $0x208] sm:$0xff] }
 0x15e   :  { %1607 = vmatprep.subr.bf16.mxu0 %v1606_v51  ;;  %v898_v51 = vld [vmem:[%s3335_s6 + $0x218] sm:$0xff] }
 0x15f   :  { %v1646_v52 = vpack.c.bf16 %v898_v51, %v896_v50  ;;  %v904_v50 = vld [vmem:[%s3335_s6 + $0x248] sm:$0xff]  ;;  %v906_v51 = vld [vmem:[%s3335_s6 + $0x258] sm:$0xff] }
 0x161   :  { %1609 = vmatpush1.bf16.msra.mxu0 %v1608_v55  ;;  %v1710_v55 = vpack.c.bf16 %v1136_v54, %v1135_v53  ;;  %v1652_v53 = vpack.c.bf16 %v901_v48, %v899_v46  ;;  %v1654_v54 = vpack.c.bf16 %v906_v51, %v904_v50  ;;  %v940_v46 = vld [vmem:[%s3335_s6 + $0x368] sm:$0xff]  ;;  %v942_v48 = vld [vmem:[%s3335_s6 + $0x378] sm:$0xff]  ;;  %v939_v51 = vld [vmem:[%s3335_s6 + $0x360] sm:$0xff] }
 0x162   :  { %1611 = vmatprep.subr.bf16.mxu0 %v1610_v56  ;;  %v1120_v56 = vld [vmem:[%s3336_s8 + $0x8] sm:$0xff]  ;;  %v1690_v50 = vpack.c.bf16 %v942_v48, %v940_v46 }
 0x163   :  { %v1712_v59 = vpack.c.bf16 %v1120_v56, %v1119_v16  ;;  %1711 = vmatprep.subr.bf16.mxu1 %v1710_v55  ;;  %v903_v16 = vld [vmem:[%s3335_s6 + $0x240] sm:$0xff]  ;;  %v905_v55 = vld [vmem:[%s3335_s6 + $0x250] sm:$0xff]  ;;  %v908_v56 = vld [vmem:[%s3335_s6 + $0x268] sm:$0xff] }
 0x164   :  { %v1656_v58 = vpack.c.bf16 %v905_v55, %v903_v16 }
 0x165   :  { %1613 = vmatpush1.bf16.msra.mxu0 %v1612_v61  ;;  %v1121_v61 = vld [vmem:[%s3336_s8 + $0x10] sm:$0xff]  ;;  %1713 = vmatpush3.bf16.msra.mxu1 %v1712_v59  ;;  %v1658_v59 = vpack.c.bf16 %v910_v57, %v908_v56  ;;  %v943_v56 = vld [vmem:[%s3335_s6 + $0x380] sm:$0xff] }
 0x166   :  { %1615 = vmatprep.subr.bf16.mxu0 %v1614_v62  ;;  %v1122_v62 = vld [vmem:[%s3336_s8 + $0x18] sm:$0xff]  ;;  %1715 = vmatprep.subr.bf16.mxu1 %v1714_v60  ;;  %v907_v60 = vld [vmem:[%s3335_s6 + $0x260] sm:$0xff]  ;;  %v945_v57 = vld [vmem:[%s3335_s6 + $0x390] sm:$0xff] }
 0x167   :  { %v1716_v1 = vpack.c.bf16 %v1122_v62, %v1121_v61  ;;  %v909_v61 = vld [vmem:[%s3335_s6 + $0x270] sm:$0xff]  ;;  %v912_v62 = vld [vmem:[%s3335_s6 + $0x288] sm:$0xff] }
 0x168   :  { %v1660_v0 = vpack.c.bf16 %v909_v61, %v907_v60  ;;  %v534_v60 = vrot.slane %v3092_v27, %v109_v21  ;;  %v1696_v61 = vpack.c.bf16 %v945_v57, %v943_v56 }
 0x169   :  { %1617 = vmatpush1.bf16.msra.mxu0 %v1616_v4  ;;  %v1123_v4 = vld [vmem:[%s3336_s8 + $0x20] sm:$0xff]  ;;  %1717 = vmatpush3.bf16.msra.mxu1 %v1716_v1  ;;  %v1662_v1 = vpack.c.bf16 %v914_v63, %v912_v62 }
 0x16a   :  { %1619 = vmatprep.subr.bf16.mxu0 %v1618_v5  ;;  %v1124_v5 = vld [vmem:[%s3336_s8 + $0x28] sm:$0xff]  ;;  %1719 = vmatprep.subr.bf16.mxu1 %v1718_v2  ;;  %v911_v2 = vld [vmem:[%s3335_s6 + $0x280] sm:$0xff] }
 0x16b   :  { %v1720_v8 = vpack.c.bf16 %v1124_v5, %v1123_v4  ;;  %v913_v4 = vld [vmem:[%s3335_s6 + $0x290] sm:$0xff]  ;;  %v916_v5 = vld [vmem:[%s3335_s6 + $0x2a8] sm:$0xff]  ;;  %v947_v63 = vld [vmem:[%s3335_s6 + $0x3a0] sm:$0xff] }
 0x16c   :  { %v1664_v7 = vpack.c.bf16 %v913_v4, %v911_v2  ;;  %v951_v4 = vld [vmem:[%s3335_s6 + $0x3c0] sm:$0xff] }
 0x16d   :  { %1621 = vmatpush1.bf16.msra.mxu0 %v1620_v10  ;;  %v1125_v10 = vld [vmem:[%s3336_s8 + $0x30] sm:$0xff]  ;;  %1721 = vmatpush3.bf16.msra.mxu1 %v1720_v8  ;;  %v1666_v8 = vpack.c.bf16 %v918_v6, %v916_v5  ;;  %v956_v6 = vld [vmem:[%s3335_s6 + $0x3e8] sm:$0xff] }
 0x16e   :  { %1623 = vmatprep.subr.bf16.mxu0 %v1622_v11  ;;  %v1126_v11 = vld [vmem:[%s3336_s8 + $0x38] sm:$0xff]  ;;  %1723 = vmatprep.subr.bf16.mxu1 %v1722_v9  ;;  %v915_v9 = vld [vmem:[%s3335_s6 + $0x2a0] sm:$0xff]  ;;  %v953_v5 = vld [vmem:[%s3335_s6 + $0x3d0] sm:$0xff] }
 0x16f   :  { %v1724_v14 = vpack.c.bf16 %v1126_v11, %v1125_v10  ;;  %v917_v10 = vld [vmem:[%s3335_s6 + $0x2b0] sm:$0xff]  ;;  %v920_v11 = vld [vmem:[%s3335_s6 + $0x2c8] sm:$0xff] }
 0x170   :  { %v1668_v13 = vpack.c.bf16 %v917_v10, %v915_v9  ;;  %v955_v9 = vld [vmem:[%s3335_s6 + $0x3e0] sm:$0xff]  ;;  %v957_v10 = vld [vmem:[%s3335_s6 + $0x3f0] sm:$0xff] }
 0x171   :  { %1625 = vmatpush1.bf16.msra.mxu0 %v1624_v17  ;;  %v1127_v17 = vld [vmem:[%s3336_s8 + $0x40] sm:$0xff]  ;;  %1725 = vmatpush3.bf16.msra.mxu1 %v1724_v14  ;;  %v1670_v14 = vpack.c.bf16 %v922_v12, %v920_v11  ;;  %v1708_v11 = vpack.c.bf16 %v957_v10, %v955_v9 }
 0x172   :  { %1627 = vmatprep.subr.bf16.mxu0 %v1626_v18  ;;  %v1128_v18 = vld [vmem:[%s3336_s8 + $0x48] sm:$0xff]  ;;  %1727 = vmatprep.subr.bf16.mxu1 %v1726_v15  ;;  %v919_v15 = vld [vmem:[%s3335_s6 + $0x2c0] sm:$0xff] }
 0x173   :  { %v1728_v22 = vpack.c.bf16 %v1128_v18, %v1127_v17  ;;  %v921_v17 = vld [vmem:[%s3335_s6 + $0x2d0] sm:$0xff]  ;;  %v924_v18 = vld [vmem:[%s3335_s6 + $0x2e8] sm:$0xff] }
 0x174   :  { %v1672_v20 = vpack.c.bf16 %v921_v17, %v919_v15  ;;  %v1131_v17 = vld [vmem:[%s3336_s8 + $0x60] sm:$0xff] }
 0x175   :  { %1629 = vmatpush1.bf16.msra.mxu0 %v1628_v24  ;;  %v1129_v24 = vld [vmem:[%s3336_s8 + $0x50] sm:$0xff]  ;;  %1729 = vmatpush3.bf16.msra.mxu1 %v1728_v22  ;;  %v1674_v22 = vpack.c.bf16 %v926_v19, %v924_v18  ;;  %v1132_v18 = vld [vmem:[%s3336_s8 + $0x68] sm:$0xff] }
 0x176   :  { %1631 = vmatprep.subr.bf16.mxu0 %v1630_v25  ;;  %v1130_v25 = vld [vmem:[%s3336_s8 + $0x58] sm:$0xff]  ;;  %1731 = vmatprep.subr.bf16.mxu1 %v1730_v23  ;;  %v923_v23 = vld [vmem:[%s3335_s6 + $0x2e0] sm:$0xff]  ;;  %v1736_v19 = vpack.c.bf16 %v1132_v18, %v1131_v17 }
 0x177   :  { %v1732_v26 = vpack.c.bf16 %v1130_v25, %v1129_v24  ;;  %v925_v24 = vld [vmem:[%s3335_s6 + $0x2f0] sm:$0xff]  ;;  %v928_v25 = vld [vmem:[%s3335_s6 + $0x308] sm:$0xff] }
 0x179   :  { %1633 = vmatpush1.bf16.msra.mxu0 %v1632_v28  ;;  %1733 = vmatpush3.bf16.msra.mxu1 %v1732_v26  ;;  %v526_v28 = vrot.slane %v3092_v27, %v2422_v43  ;;  %v930_v26 = vld [vmem:[%s3335_s6 + $0x318] sm:$0xff] }
 0x17a   :  { %1635 = vmatprep.subr.bf16.mxu0 %v1634_v31 }
 0x17d   :  { %1637 = vmatpush1.bf16.msra.mxu0 %v1636_v34 }
 0x17e   :  { %1639 = vmatprep.subr.bf16.mxu0 %v1638_v37  ;;  %v895_v37 = vld [vmem:[%s3335_s6 + $0x200] sm:$0xff] }
 0x17f   :  { %v1648_v39 = vpack.c.bf16 %v897_v38, %v895_v37  ;;  %v933_v37 = vld [vmem:[%s3335_s6 + $0x330] sm:$0xff]  ;;  %v936_v38 = vld [vmem:[%s3335_s6 + $0x348] sm:$0xff] }
 0x181   :  { %1641 = vmatpush1.bf16.msra.mxu0 %v1640_v40 }
 0x182   :  { %1643 = vmatprep.subr.bf16.mxu0 %v1642_v41  ;;  %v1650_v41 = vpack.c.bf16 %v902_v44, %v900_v47  ;;  %v938_v47 = vld [vmem:[%s3335_s6 + $0x358] sm:$0xff] }
 0x185   :  { %1645 = vmatpush1.bf16.msra.mxu0 %v1644_v49 }
 0x186   :  { %1647 = vmatprep.subr.bf16.mxu0 %v1646_v52 }
 0x21b   :  { %v680_v31 = vpop.f32.mrb[0].mxu0  ;;  %v3101_v32 = vpop.f32.mrb[4].mxu1 }
 0x21c   :  { %v682_v33 = vpop.f32.mrb[1].mxu0  ;;  %v824_v34 = vpop.f32.mrb[5].mxu1  ;;  %v1742_v3 = vadd.f32 %v680_v31, %v526_v28  ;;  %v1676_v28 = vpack.c.bf16 %v925_v24, %v923_v23  ;;  %v929_v31 = vld [vmem:[%s3335_s6 + $0x310] sm:$0xff]  ;;  %v1744_v21 = vadd.f32 %v3101_v32, %v534_v60  ;;  %v958_v32 = vld [vmem:[%s3335_s6 + $0x3f8] sm:$0xff] }
 0x21d   :  { %v1743_v35 = vadd.f32 %v682_v33, %v530_v29  ;;  %v1745_v36 = vadd.f32 %v824_v34, %v538_v30  ;;  %v1678_v29 = vpack.c.bf16 %v930_v26, %v928_v25  ;;  %v927_v30 = vld [vmem:[%s3335_s6 + $0x300] sm:$0xff]  ;;  %v932_v33 = vld [vmem:[%s3335_s6 + $0x328] sm:$0xff]  ;;  %v934_v34 = vld [vmem:[%s3335_s6 + $0x338] sm:$0xff] }
 0x21e   :  { %v1133_v24 = vld [vmem:[%s3336_s8 + $0x70] sm:$0xff]  ;;  %v1134_v25 = vld [vmem:[%s3336_s8 + $0x78] sm:$0xff] }
 0x21f   :  { %1763 = vtanh.f32 %v1743_v35  ;;  %v1682_v35 = vpack.c.bf16 %v934_v34, %v932_v33  ;;  %v1740_v26 = vpack.c.bf16 %v1134_v25, %v1133_v24  ;;  %v1113_v33 = vld [vmem:[%s3339_s1] sm:$0xff] }
 0x220   :  { %1765 = vtanh.f32 %v1742_v3  ;;  %v1680_v3 = vpack.c.bf16 %v929_v31, %v927_v30 }
 0x221   :  { %1767 = vtanh.f32 %v1745_v36  ;;  %v931_v36 = vld [vmem:[%s3335_s6 + $0x320] sm:$0xff] }
 0x222   :  { %v1684_v44 = vpack.c.bf16 %v933_v37, %v931_v36  ;;  %1769 = vtanh.f32 %v1744_v21 }
 0x229   :  { %v1764_v40 = vpop.eup %1763 }
 0x22a   :  { %v1766_v49 = vpop.eup %1765  ;;  %1035 = vmatprep.mubr.f32.mxu0 %v1764_v40  ;;  %v935_v40 = vld [vmem:[%s3335_s6 + $0x340] sm:$0xff] }
 0x22b   :  { %v1768_v52 = vpop.eup %1767  ;;  %1036 = vmatmul.mubr.f32.vlgmr.msra.gmra.mrb[2].mxu0 %v1766_v49 }
 0x22c   :  { %1649 = vmatpush1.bf16.msra.mxu0 %v1648_v39  ;;  %1106 = vmatprep.mubr.f32.mxu0 %v1768_v52  ;;  %v1686_v39 = vpack.c.bf16 %v938_v47, %v936_v38  ;;  %v941_v52 = vld [vmem:[%s3335_s6 + $0x370] sm:$0xff]  ;;  %v1770_v12 = vpop.eup %1769 }
 0x22d   :  { %1651 = vmatprep.subr.bf16.mxu0 %v1650_v41  ;;  %v937_v41 = vld [vmem:[%s3335_s6 + $0x350] sm:$0xff]  ;;  %v1692_v16 = vpack.c.bf16 %v941_v52, %v939_v51 }
 0x22e   :  { %v1688_v49 = vpack.c.bf16 %v937_v41, %v935_v40 }
 0x230   :  { %1653 = vmatpush1.bf16.msra.mxu0 %v1652_v53  ;;  %v944_v53 = vld [vmem:[%s3335_s6 + $0x388] sm:$0xff] }
 0x231   :  { %1655 = vmatprep.subr.bf16.mxu0 %v1654_v54  ;;  %v946_v54 = vld [vmem:[%s3335_s6 + $0x398] sm:$0xff] }
 0x232   :  { %v1694_v55 = vpack.c.bf16 %v946_v54, %v944_v53 }
 0x234   :  { %1657 = vmatpush1.bf16.msra.mxu0 %v1656_v58  ;;  %v948_v58 = vld [vmem:[%s3335_s6 + $0x3a8] sm:$0xff] }
 0x235   :  { %1659 = vmatprep.subr.bf16.mxu0 %v1658_v59  ;;  %v950_v59 = vld [vmem:[%s3335_s6 + $0x3b8] sm:$0xff] }
 0x236   :  { %v1698_v62 = vpack.c.bf16 %v950_v59, %v948_v58 }
 0x238   :  { %1661 = vmatpush1.bf16.msra.mxu0 %v1660_v0  ;;  %v949_v0 = vld [vmem:[%s3335_s6 + $0x3b0] sm:$0xff] }
 0x239   :  { %1663 = vmatprep.subr.bf16.mxu0 %v1662_v1  ;;  %v952_v1 = vld [vmem:[%s3335_s6 + $0x3c8] sm:$0xff]  ;;  %v1700_v27 = vpack.c.bf16 %v949_v0, %v947_v63 }
 0x23a   :  { %v1702_v2 = vpack.c.bf16 %v954_v42, %v952_v1 }
 0x23c   :  { %1665 = vmatpush1.bf16.msra.mxu0 %v1664_v7  ;;  %v1704_v7 = vpack.c.bf16 %v953_v5, %v951_v4 }
 0x23d   :  { %1667 = vmatprep.subr.bf16.mxu0 %v1666_v8  ;;  %v1706_v8 = vpack.c.bf16 %v958_v32, %v956_v6 }
 0x240   :  { %1669 = vmatpush1.bf16.msra.mxu0 %v1668_v13  ;;  %v1147_v13 = vld [vmem:[%s3336_s8 + $0xe0] sm:$0xff] }
 0x241   :  { %1671 = vmatprep.subr.bf16.mxu0 %v1670_v14  ;;  %v1148_v14 = vld [vmem:[%s3336_s8 + $0xe8] sm:$0xff] }
 0x242   :  { %v1734_v15 = vpack.c.bf16 %v1148_v14, %v1147_v13 }
 0x244   :  { %1673 = vmatpush1.bf16.msra.mxu0 %v1672_v20  ;;  %1735 = vmatprep.subr.bf16.mxu1 %v1734_v15  ;;  %v1149_v20 = vld [vmem:[%s3336_s8 + $0xf0] sm:$0xff] }
 0x245   :  { %1675 = vmatprep.subr.bf16.mxu0 %v1674_v22  ;;  %1737 = vmatpush3.bf16.msra.mxu1 %v1736_v19  ;;  %v1150_v22 = vld [vmem:[%s3336_s8 + $0xf8] sm:$0xff] }
 0x246   :  { %v1738_v23 = vpack.c.bf16 %v1150_v22, %v1149_v20 }
 0x248   :  { %1677 = vmatpush1.bf16.msra.mxu0 %v1676_v28  ;;  %1739 = vmatprep.subr.bf16.mxu1 %v1738_v23  ;;  %v959_v28 = vld [vmem:[%s3338_s7] sm:$0x3] }
 0x249   :  { %1679 = vmatprep.subr.bf16.mxu0 %v1678_v29  ;;  %1741 = vmatpush3.bf16.msra.mxu1 %v1740_v26  ;;  %v964_v29 = vrot.slane %v959_v28, %v2422_v43  ;;  %v968_v30 = vrot.slane %v959_v28, %v2430_v45 }
 0x24c   :  { %1681 = vmatpush1.bf16.msra.mxu0 %v1680_v3 }
 0x24d   :  { %1683 = vmatprep.subr.bf16.mxu0 %v1682_v35  ;;  %v1114_v35 = vld [vmem:[%s3339_s1 + $0x8] sm:$0xff] }
 0x250   :  { %1685 = vmatpush1.bf16.msra.mxu0 %v1684_v44 }
 0x251   :  { %1687 = vmatprep.subr.bf16.mxu0 %v1686_v39 }
 0x254   :  { %1689 = vmatpush1.bf16.msra.mxu0 %v1688_v49 }
 0x255   :  { %1691 = vmatprep.subr.bf16.mxu0 %v1690_v50 }
 0x258   :  { %1693 = vmatpush1.bf16.msra.mxu0 %v1692_v16 }
 0x259   :  { %1695 = vmatprep.subr.bf16.mxu0 %v1694_v55 }
 0x25c   :  { %1697 = vmatpush1.bf16.msra.mxu0 %v1696_v61 }
 0x25d   :  { %1699 = vmatprep.subr.bf16.mxu0 %v1698_v62 }
 0x260   :  { %1701 = vmatpush1.bf16.msra.mxu0 %v1700_v27 }
 0x261   :  { %1703 = vmatprep.subr.bf16.mxu0 %v1702_v2 }
 0x264   :  { %1705 = vmatpush1.bf16.msra.mxu0 %v1704_v7 }
 0x265   :  { %1707 = vmatprep.subr.bf16.mxu0 %v1706_v8 }
 0x268   :  { %1709 = vmatpush1.bf16.msra.mxu0 %v1708_v11 }
 0x26b   :  { %1107 = vmatmul.mubr.f32.vlgmr.msra.gmra.mrb[2].mxu0 %v1770_v12 }
 0x33e   :  { %v1108_v31 = vpop.f32.mrb[2].mxu0 }
 0x33f   :  { %v1746_v34 = vadd.f32 %v1108_v31, %v964_v29  ;;  %v1110_v3 = vpop.f32.mrb[3].mxu0 }
 0x340   :  { %v1747_v36 = vadd.f32 %v1110_v3, %v968_v30 }
 0x341   :  { %v1115_v37 = vsub.f32 %v1746_v34, %v1113_v33 }
 0x342   :  { %v1116_v38 = vsub.f32 %v1747_v36, %v1114_v35 }
 0x343   :  { %v1117_v44 = vmul.f32 %v1115_v37, %v1115_v37 }
 0x344   :  { %v1118_v47 = vmul.f32 %v1116_v38, %v1116_v38 }
 0x346   :  { %1215 = vmatprep.mubr.f32.mxu1 %v1118_v47 }
 0x347   :  { %1216 = vmatmul.mubr.f32.vlgmr.msra.gmra.mrb[6].mxu1 %v1117_v44 }
 0x41a   :  { %v1259_v43 = vpop.f32.mrb[6].mxu1 }
 0x41b   :  { %v1260_v45 = vpop.f32.mrb[7].mxu1 }
 0x41c   :  { %v1261_v39 = vadd.f32 %v1260_v45, %v1259_v43 }
 0x41e   :  { %1222 = vst.msk [vmem:[%s3340_s9] sm:$0xff] %vm1221_vm0, %v1261_v39 }

</bundles_post_ra>
